<compile_context>
chip_gen: v6e
topology: v6e:2x2x1
jax: 0.10.0
libtpu: 0.0.40
codegen_flags: <defaults>
</compile_context>

<pallas_src>
import functools

import numpy as np

import jax
import jax.numpy as jnp
from jax import lax
from jax.experimental import pallas as pl
from jax.experimental.pallas import tpu as pltpu


_TAPS = ((0, 0), (0, 1), (1, 0), (1, 1))

# (output-row parity i, window offset a, source sub-pixel parity ip) -> 3x3 tap
# offset dh (None => that combination never occurs => zero weight).  Same table
# is used for the column direction (j, b, jp) -> dw.
_DH = {(0, 0, 1): -1, (0, 1, 0): 0, (0, 1, 1): 1,
       (1, 0, 0): -1, (1, 0, 1): 0, (1, 1, 0): 1}


# ----------------------------------------------------------------------------
# Fused Pallas kernel: one batch element per grid step.
# ----------------------------------------------------------------------------
def _unet_block_kernel(xs_ref, wd_ref, bd_ref, ww_ref, bw_ref, wu_ref, bu_ref,
                       out_ref, y2p_ref, *, ho, wo, cin, inner, outer):
    hw = ho * wo

    # LeakyReLU(0.2) applied ONCE to the (space-to-depth, pad-1) source tile.
    # VPU math in f32 (v5e-safe); cast to bf16 only for the MXU.
    xs = xs_ref[0]                                        # (ho+1, wo+1, 4*cin)
    xs = jnp.where(xs > 0, xs, 0.2 * xs).astype(jnp.bfloat16)

    # ---- down conv: Conv4x4/s2/p1 == Conv2x2/s1 over the space-to-depth tile.
    # Accumulating dots over shifted static slices (no im2col, no strides).
    acc = jnp.zeros((hw, inner), jnp.float32)
    for t, (a, b) in enumerate(_TAPS):
        patch = xs[a:a + ho, b:b + wo, :].reshape(hw, 4 * cin)
        acc = acc + jnp.dot(patch, wd_ref[t],
                            preferred_element_type=jnp.float32)
    acc = acc + bd_ref[...]                               # (1, inner) broadcast
    d = jnp.maximum(acc, 0.0)                             # ReLU (start of up path)

    # ---- wide 1x1 conv (out-channels pre-permuted to parity-major) + LeakyReLU
    y2 = jnp.dot(d.astype(jnp.bfloat16), ww_ref[...],
                 preferred_element_type=jnp.float32) + bw_ref[...]
    y2 = jnp.where(y2 > 0, y2, 0.2 * y2)                  # (hw, 4*inner), f32

    # Zero-padded pre-shuffle map kept in VMEM scratch (pad=1 each side).
    y2p_ref[...] = jnp.zeros_like(y2p_ref)
    y2p_ref[1:ho + 1, 1:wo + 1, :] = y2.reshape(ho, wo, 4 * inner)

    # ---- PixelShuffle(2) + Conv3x3/p1 folded: four parity-specific 2x2 convs.
    # Output written channel-major so the out block is lane-dense (4*hw lanes).
    for p, (i, j) in enumerate(_TAPS):                    # output parity (i, j)
        acc_p = jnp.zeros((outer, hw), jnp.float32)
        for t, (a, b) in enumerate(_TAPS):                # 2x2 window tap (a, b)
            sl = y2p_ref[i + a:i + a + ho, j + b:j + b + wo, :]
            patch = sl.reshape(hw, 4 * inner).astype(jnp.bfloat16)
            # (outer, K) x (hw, K)^T -> (outer, hw); transposed-RHS matmul.
            acc_p = acc_p + lax.dot_general(
                wu_ref[p, t], patch,
                dimension_numbers=(((1,), (1,)), ((), ())),
                preferred_element_type=jnp.float32)
        acc_p = acc_p + bu_ref[...]                       # (outer, 1) broadcast
        out_ref[0, :, p * hw:(p + 1) * hw] = acc_p


# ----------------------------------------------------------------------------
# Wrapper: cheap XLA layout glue + the single fused pallas_call.
# ----------------------------------------------------------------------------
def unet_skip_block_forward(x_nchw, params):
    n, cin, h, w = x_nchw.shape
    assert h % 2 == 0 and w % 2 == 0, "stride-2 down conv needs even H, W"
    ho, wo = h // 2, w // 2
    inner = params["w_wide"].shape[0]
    outer = params["w_up_t"].shape[2]
    assert params["w_down_t"].shape[1] == 4 * cin

    x = x_nchw.astype(jnp.float32)

    # pad-1 + space-to-depth(2): non-duplicating rearrangement that turns the
    # strided 4x4 conv into a dense 2x2 conv for the kernel (replaces the old
    # 16x im2col HBM expansion).
    xp = jnp.pad(x, ((0, 0), (0, 0), (1, 1), (1, 1)))
    xs = xp.reshape(n, cin, ho + 1, 2, wo + 1, 2)
    xs = xs.transpose(0, 2, 4, 3, 5, 1).reshape(n, ho + 1, wo + 1, 4 * cin)

    kernel = functools.partial(_unet_block_kernel, ho=ho, wo=wo, cin=cin,
                               inner=inner, outer=outer)
    conv = pl.pallas_call(
        kernel,
        out_shape=jax.ShapeDtypeStruct((n, outer, 4 * ho * wo), jnp.float32),
        grid=(n,),
        in_specs=[
            pl.BlockSpec((1, ho + 1, wo + 1, 4 * cin), lambda b: (b, 0, 0, 0)),
            pl.BlockSpec((4, 4 * cin, inner), lambda b: (0, 0, 0)),
            pl.BlockSpec((1, inner), lambda b: (0, 0)),
            pl.BlockSpec((inner, 4 * inner), lambda b: (0, 0)),
            pl.BlockSpec((1, 4 * inner), lambda b: (0, 0)),
            pl.BlockSpec((4, 4, outer, 4 * inner), lambda b: (0, 0, 0, 0)),
            pl.BlockSpec((outer, 1), lambda b: (0, 0)),
        ],
        out_specs=pl.BlockSpec((1, outer, 4 * ho * wo), lambda b: (b, 0, 0)),
        scratch_shapes=[pltpu.VMEM((ho + 2, wo + 2, 4 * inner), jnp.float32)],
        compiler_params=pltpu.CompilerParams(
            dimension_semantics=("parallel",),          # v7x: split batch over 2 TCs
            vmem_limit_bytes=32 * 1024 * 1024,
        ),
    )(xs, params["w_down_t"], params["b_down"], params["w_wide"],
      params["b_wide"], params["w_up_t"], params["b_up"])

    # depth-to-space of the parity-major conv output, then the skip concat
    # (small final tensors; left to XLA rather than in-kernel transposes).
    y = conv.reshape(n, outer, 2, 2, ho, wo)
    y = y.transpose(0, 1, 4, 2, 5, 3).reshape(n, outer, h, w)
    return jnp.concatenate([x, y], axis=1)


# ----------------------------------------------------------------------------
# Parameters: PyTorch-layout weights + repacking into the fused-kernel layout.
# ----------------------------------------------------------------------------
def make_torch_params(input_nc, inner_nc, outer_nc, key):
    """Synthetic weights in the PyTorch Conv2d layout (OIHW) and init scale."""
    ks = jax.random.split(key, 6)

    def uinit(k, shape, fan_in):
        bound = 1.0 / np.sqrt(float(fan_in))
        return jax.random.uniform(k, shape, jnp.float32, -bound, bound)

    return dict(
        w_down=uinit(ks[0], (inner_nc, input_nc, 4, 4), input_nc * 16),
        b_down=uinit(ks[1], (inner_nc,), input_nc * 16),
        w_wide=uinit(ks[2], (4 * inner_nc, inner_nc, 1, 1), inner_nc),
        b_wide=uinit(ks[3], (4 * inner_nc,), inner_nc),
        w_up=uinit(ks[4], (outer_nc, inner_nc, 3, 3), inner_nc * 9),
        b_up=uinit(ks[5], (outer_nc,), inner_nc * 9),
    )


def pack_params(tp):
    """Repack PyTorch-layout weights into the fused-kernel layout.

    w_down_t[a*2+b, (di*2+dj)*cin + ci, co]   : 2x2 conv over the s2d input
    w_wide / b_wide columns permuted to p*inner + c (p = i*2 + j)
    w_up_t[p, a*2+b, co, (ip*2+jp)*inner + c] : PixelShuffle folded into Conv3x3
    """
    w4 = np.asarray(tp["w_down"])                      # (inner, cin, 4, 4)
    inner, cin = w4.shape[0], w4.shape[1]
    w3 = np.asarray(tp["w_up"])                        # (outer, inner, 3, 3)
    outer = w3.shape[0]

    wd = w4.reshape(inner, cin, 2, 2, 2, 2)            # (co, ci, a, di, b, dj)
    wd = wd.transpose(2, 4, 3, 5, 1, 0).reshape(4, 4 * cin, inner)

    w1 = np.asarray(tp["w_wide"])[:, :, 0, 0]          # (c*4 + p, ci)
    ww = w1.reshape(inner, 4, inner).transpose(2, 1, 0).reshape(inner, 4 * inner)
    bw = np.asarray(tp["b_wide"]).reshape(inner, 4).transpose(1, 0)
    bw = bw.reshape(1, 4 * inner)

    wu = np.zeros((4, 4, outer, 4 * inner), np.float32)
    for i in range(2):
        for j in range(2):
            for a in range(2):
                for b in range(2):
                    for ip in range(2):
                        for jp in range(2):
                            dh = _DH.get((i, a, ip))
                            dw = _DH.get((j, b, jp))
                            if dh is None or dw is None:
                                continue
                            q = (ip * 2 + jp) * inner
                            wu[i * 2 + j, a * 2 + b, :, q:q + inner] = \
                                w3[:, :, dh + 1, dw + 1]

    return dict(
        w_down_t=jnp.asarray(wd, jnp.bfloat16),
        b_down=jnp.asarray(np.asarray(tp["b_down"]).reshape(1, inner), jnp.float32),
        w_wide=jnp.asarray(ww, jnp.bfloat16),
        b_wide=jnp.asarray(bw, jnp.float32),
        w_up_t=jnp.asarray(wu, jnp.bfloat16),
        b_up=jnp.asarray(np.asarray(tp["b_up"]).reshape(outer, 1), jnp.float32),
    )


# ----------------------------------------------------------------------------
# Pure-XLA reference (uses the PyTorch-layout weights directly).
# ----------------------------------------------------------------------------
def _ref_forward(x, tp):
    dn = ("NCHW", "OIHW", "NCHW")
    prec = lax.Precision.HIGHEST
    h = jnp.where(x > 0, x, 0.2 * x)
    h = lax.conv_general_dilated(h, tp["w_down"], (2, 2), ((1, 1), (1, 1)),
                                 dimension_numbers=dn, precision=prec)
    h = h + tp["b_down"][None, :, None, None]
    h = jnp.maximum(h, 0.0)
    h = lax.conv_general_dilated(h, tp["w_wide"], (1, 1), ((0, 0), (0, 0)),
                                 dimension_numbers=dn, precision=prec)
    h = h + tp["b_wide"][None, :, None, None]
    h = jnp.where(h > 0, h, 0.2 * h)
    n, c4, ho, wo = h.shape
    c = c4 // 4
    h = h.reshape(n, c, 2, 2, ho, wo).transpose(0, 1, 4, 2, 5, 3)
    h = h.reshape(n, c, ho * 2, wo * 2)                 # PixelShuffle(2)
    h = lax.conv_general_dilated(h, tp["w_up"], (1, 1), ((1, 1), (1, 1)),
                                 dimension_numbers=dn, precision=prec)
    h = h + tp["b_up"][None, :, None, None]
    return jnp.concatenate([x, h], axis=1)


if __name__ == "__main__":
    key = jax.random.PRNGKey(0)
    kx, kp = jax.random.split(key)

    batch, input_nc, h, w = 2, 4, 16, 16
    inner_nc, outer_nc = 8, 4          # input_nc defaults to outer_nc in the module

    x = jax.random.normal(kx, (batch, input_nc, h, w), jnp.float32)
    torch_params = make_torch_params(input_nc, inner_nc, outer_nc, kp)
    params = pack_params(torch_params)

    out = jax.jit(unet_skip_block_forward)(x, params)
    out = jax.block_until_ready(out)

    assert out.shape == (batch, input_nc + outer_nc, h, w), out.shape
    assert bool(jnp.all(jnp.isfinite(out)))

    ref = _ref_forward(x, torch_params)
    err = float(jnp.max(jnp.abs(out - ref)))
    assert err < 5e-2, f"max |pallas - reference| = {err}"
    print("KERNEL_OK")
</pallas_src>

<mosaic_0001>
module attributes {stable_mosaic.version = 11 : i64} {
  func.func @_unet_block_kernel(%arg0: i32, %arg1: memref<1x9x9x16xf32, #tpu.memory_space<vmem>>, %arg2: memref<4x16x8xbf16, #tpu.memory_space<vmem>>, %arg3: memref<1x8xf32, #tpu.memory_space<vmem>>, %arg4: memref<8x32xbf16, #tpu.memory_space<vmem>>, %arg5: memref<1x32xf32, #tpu.memory_space<vmem>>, %arg6: memref<4x4x4x32xbf16, #tpu.memory_space<vmem>>, %arg7: memref<4x1xf32, #tpu.memory_space<vmem>>, %arg8: memref<1x4x256xf32, #tpu.memory_space<vmem>>, %arg9: memref<10x10x32xf32, #tpu.memory_space<vmem>>) attributes {dimension_semantics = [#tpu.dimension_semantics<parallel>], iteration_bounds = array<i64: 2>, scalar_prefetch = 0 : i64, scratch_operands = 1 : i64, tpu.core_type = #tpu.core_type<tc>, window_params = [{transform_indices = @transform_0, window_bounds = array<i64: 1, 9, 9, 16>}, {pipeline_mode = #tpu.pipeline_mode<synchronous>, transform_indices = @transform_1, window_bounds = array<i64: 4, 16, 8>}, {pipeline_mode = #tpu.pipeline_mode<synchronous>, transform_indices = @transform_2, window_bounds = array<i64: 1, 8>}, {pipeline_mode = #tpu.pipeline_mode<synchronous>, transform_indices = @transform_3, window_bounds = array<i64: 8, 32>}, {pipeline_mode = #tpu.pipeline_mode<synchronous>, transform_indices = @transform_4, window_bounds = array<i64: 1, 32>}, {pipeline_mode = #tpu.pipeline_mode<synchronous>, transform_indices = @transform_5, window_bounds = array<i64: 4, 4, 4, 32>}, {pipeline_mode = #tpu.pipeline_mode<synchronous>, transform_indices = @transform_6, window_bounds = array<i64: 4, 1>}, {transform_indices = @transform_7, window_bounds = array<i64: 1, 4, 256>}]} {
    %c0 = arith.constant 0 : index
    %c0_0 = arith.constant 0 : index
    %c0_1 = arith.constant 0 : index
    %c0_2 = arith.constant 0 : index
    %0 = vector.load %arg1[%c0, %c0_0, %c0_1, %c0_2] : memref<1x9x9x16xf32, #tpu.memory_space<vmem>>, vector<1x9x9x16xf32>
    %1 = vector.shape_cast %0 : vector<1x9x9x16xf32> to vector<9x9x16xf32>
    %cst = arith.constant 0.000000e+00 : f32
    %2 = vector.broadcast %cst : f32 to vector<9x9x16xf32>
    %3 = arith.cmpf ogt, %1, %2 : vector<9x9x16xf32>
    %cst_3 = arith.constant 2.000000e-01 : f32
    %4 = vector.broadcast %cst_3 : f32 to vector<9x9x16xf32>
    %5 = arith.mulf %4, %1 : vector<9x9x16xf32>
    %6 = arith.select %3, %1, %5 : vector<9x9x16xi1>, vector<9x9x16xf32>
    %7 = arith.truncf %6 : vector<9x9x16xf32> to vector<9x9x16xbf16>
    %cst_4 = arith.constant 0.000000e+00 : f32
    %8 = vector.broadcast %cst_4 : f32 to vector<64x8xf32>
    %9 = vector.extract_strided_slice %7 {offsets = [0, 0, 0], sizes = [8, 8, 16], strides = [1, 1, 1]} : vector<9x9x16xbf16> to vector<8x8x16xbf16>
    %10 = vector.shape_cast %9 : vector<8x8x16xbf16> to vector<64x16xbf16>
    %c0_5 = arith.constant 0 : index
    %c0_6 = arith.constant 0 : index
    %c0_7 = arith.constant 0 : index
    %11 = vector.load %arg2[%c0_5, %c0_6, %c0_7] : memref<4x16x8xbf16, #tpu.memory_space<vmem>>, vector<1x16x8xbf16>
    %12 = vector.shape_cast %11 : vector<1x16x8xbf16> to vector<16x8xbf16>
    %cst_8 = arith.constant dense<0.000000e+00> : vector<64x8xf32>
    %13 = tpu.matmul %10, %12, %cst_8 {dimension_numbers = #tpu.dot_dimension_numbers<[1], [0], [0], [1], [0, 0, 1, 1], [], []>} : vector<64x16xbf16>, vector<16x8xbf16>, vector<64x8xf32> -> vector<64x8xf32>
    %14 = arith.addf %8, %13 : vector<64x8xf32>
    %15 = vector.extract_strided_slice %7 {offsets = [0, 1, 0], sizes = [8, 8, 16], strides = [1, 1, 1]} : vector<9x9x16xbf16> to vector<8x8x16xbf16>
    %16 = vector.shape_cast %15 : vector<8x8x16xbf16> to vector<64x16xbf16>
    %c1 = arith.constant 1 : index
    %c0_9 = arith.constant 0 : index
    %c0_10 = arith.constant 0 : index
    %17 = vector.load %arg2[%c1, %c0_9, %c0_10] : memref<4x16x8xbf16, #tpu.memory_space<vmem>>, vector<1x16x8xbf16>
    %18 = vector.shape_cast %17 : vector<1x16x8xbf16> to vector<16x8xbf16>
    %cst_11 = arith.constant dense<0.000000e+00> : vector<64x8xf32>
    %19 = tpu.matmul %16, %18, %cst_11 {dimension_numbers = #tpu.dot_dimension_numbers<[1], [0], [0], [1], [0, 0, 1, 1], [], []>} : vector<64x16xbf16>, vector<16x8xbf16>, vector<64x8xf32> -> vector<64x8xf32>
    %20 = arith.addf %14, %19 : vector<64x8xf32>
    %21 = vector.extract_strided_slice %7 {offsets = [1, 0, 0], sizes = [8, 8, 16], strides = [1, 1, 1]} : vector<9x9x16xbf16> to vector<8x8x16xbf16>
    %22 = vector.shape_cast %21 : vector<8x8x16xbf16> to vector<64x16xbf16>
    %c2 = arith.constant 2 : index
    %c0_12 = arith.constant 0 : index
    %c0_13 = arith.constant 0 : index
    %23 = vector.load %arg2[%c2, %c0_12, %c0_13] : memref<4x16x8xbf16, #tpu.memory_space<vmem>>, vector<1x16x8xbf16>
    %24 = vector.shape_cast %23 : vector<1x16x8xbf16> to vector<16x8xbf16>
    %cst_14 = arith.constant dense<0.000000e+00> : vector<64x8xf32>
    %25 = tpu.matmul %22, %24, %cst_14 {dimension_numbers = #tpu.dot_dimension_numbers<[1], [0], [0], [1], [0, 0, 1, 1], [], []>} : vector<64x16xbf16>, vector<16x8xbf16>, vector<64x8xf32> -> vector<64x8xf32>
    %26 = arith.addf %20, %25 : vector<64x8xf32>
    %27 = vector.extract_strided_slice %7 {offsets = [1, 1, 0], sizes = [8, 8, 16], strides = [1, 1, 1]} : vector<9x9x16xbf16> to vector<8x8x16xbf16>
    %28 = vector.shape_cast %27 : vector<8x8x16xbf16> to vector<64x16xbf16>
    %c3 = arith.constant 3 : index
    %c0_15 = arith.constant 0 : index
    %c0_16 = arith.constant 0 : index
    %29 = vector.load %arg2[%c3, %c0_15, %c0_16] : memref<4x16x8xbf16, #tpu.memory_space<vmem>>, vector<1x16x8xbf16>
    %30 = vector.shape_cast %29 : vector<1x16x8xbf16> to vector<16x8xbf16>
    %cst_17 = arith.constant dense<0.000000e+00> : vector<64x8xf32>
    %31 = tpu.matmul %28, %30, %cst_17 {dimension_numbers = #tpu.dot_dimension_numbers<[1], [0], [0], [1], [0, 0, 1, 1], [], []>} : vector<64x16xbf16>, vector<16x8xbf16>, vector<64x8xf32> -> vector<64x8xf32>
    %32 = arith.addf %26, %31 : vector<64x8xf32>
    %c0_18 = arith.constant 0 : index
    %c0_19 = arith.constant 0 : index
    %33 = vector.load %arg3[%c0_18, %c0_19] : memref<1x8xf32, #tpu.memory_space<vmem>>, vector<1x8xf32>
    %34 = vector.broadcast %33 : vector<1x8xf32> to vector<64x8xf32>
    %35 = arith.addf %32, %34 : vector<64x8xf32>
    %cst_20 = arith.constant 0.000000e+00 : f32
    %36 = vector.broadcast %cst_20 : f32 to vector<64x8xf32>
    %37 = arith.maximumf %35, %36 : vector<64x8xf32>
    %38 = arith.truncf %37 : vector<64x8xf32> to vector<64x8xbf16>
    %c0_21 = arith.constant 0 : index
    %c0_22 = arith.constant 0 : index
    %39 = vector.load %arg4[%c0_21, %c0_22] : memref<8x32xbf16, #tpu.memory_space<vmem>>, vector<8x32xbf16>
    %cst_23 = arith.constant dense<0.000000e+00> : vector<64x32xf32>
    %40 = tpu.matmul %38, %39, %cst_23 {dimension_numbers = #tpu.dot_dimension_numbers<[1], [0], [0], [1], [0, 0, 1, 1], [], []>} : vector<64x8xbf16>, vector<8x32xbf16>, vector<64x32xf32> -> vector<64x32xf32>
    %c0_24 = arith.constant 0 : index
    %c0_25 = arith.constant 0 : index
    %41 = vector.load %arg5[%c0_24, %c0_25] : memref<1x32xf32, #tpu.memory_space<vmem>>, vector<1x32xf32>
    %42 = vector.broadcast %41 : vector<1x32xf32> to vector<64x32xf32>
    %43 = arith.addf %40, %42 : vector<64x32xf32>
    %cst_26 = arith.constant 0.000000e+00 : f32
    %44 = vector.broadcast %cst_26 : f32 to vector<64x32xf32>
    %45 = arith.cmpf ogt, %43, %44 : vector<64x32xf32>
    %cst_27 = arith.constant 2.000000e-01 : f32
    %46 = vector.broadcast %cst_27 : f32 to vector<64x32xf32>
    %47 = arith.mulf %46, %43 : vector<64x32xf32>
    %48 = arith.select %45, %43, %47 : vector<64x32xi1>, vector<64x32xf32>
    %cst_28 = arith.constant 0.000000e+00 : f32
    %49 = vector.broadcast %cst_28 : f32 to vector<10x10x32xf32>
    %c0_29 = arith.constant 0 : index
    %c0_30 = arith.constant 0 : index
    %c0_31 = arith.constant 0 : index
    %50 = vector.load %arg9[%c0_29, %c0_30, %c0_31] : memref<10x10x32xf32, #tpu.memory_space<vmem>>, vector<10x10x32xf32>
    tpu.vector_store %arg9[%c0_29, %c0_30, %c0_31], %49 {strides = array<i32>} : memref<10x10x32xf32, #tpu.memory_space<vmem>>, vector<10x10x32xf32>,
    %51 = vector.shape_cast %48 : vector<64x32xf32> to vector<8x8x32xf32>
    %c1_32 = arith.constant 1 : index
    %c1_33 = arith.constant 1 : index
    %c0_34 = arith.constant 0 : index
    %52 = vector.load %arg9[%c1_32, %c1_33, %c0_34] : memref<10x10x32xf32, #tpu.memory_space<vmem>>, vector<8x8x32xf32>
    tpu.vector_store %arg9[%c1_32, %c1_33, %c0_34], %51 {strides = array<i32>} : memref<10x10x32xf32, #tpu.memory_space<vmem>>, vector<8x8x32xf32>,
    %cst_35 = arith.constant 0.000000e+00 : f32
    %53 = vector.broadcast %cst_35 : f32 to vector<4x64xf32>
    %c0_36 = arith.constant 0 : index
    %c0_37 = arith.constant 0 : index
    %c0_38 = arith.constant 0 : index
    %54 = vector.load %arg9[%c0_36, %c0_37, %c0_38] : memref<10x10x32xf32, #tpu.memory_space<vmem>>, vector<8x8x32xf32>
    %55 = vector.shape_cast %54 : vector<8x8x32xf32> to vector<64x32xf32>
    %56 = arith.truncf %55 : vector<64x32xf32> to vector<64x32xbf16>
    %c0_39 = arith.constant 0 : index
    %c0_40 = arith.constant 0 : index
    %c0_41 = arith.constant 0 : index
    %c0_42 = arith.constant 0 : index
    %57 = vector.load %arg6[%c0_39, %c0_40, %c0_41, %c0_42] : memref<4x4x4x32xbf16, #tpu.memory_space<vmem>>, vector<1x1x4x32xbf16>
    %58 = vector.shape_cast %57 : vector<1x1x4x32xbf16> to vector<4x32xbf16>
    %cst_43 = arith.constant dense<0.000000e+00> : vector<4x64xf32>
    %59 = tpu.matmul %58, %56, %cst_43 {dimension_numbers = #tpu.dot_dimension_numbers<[1], [1], [0], [0], [0, 0, 1, 0], [], []>} : vector<4x32xbf16>, vector<64x32xbf16>, vector<4x64xf32> -> vector<4x64xf32>
    %60 = arith.addf %53, %59 : vector<4x64xf32>
    %c0_44 = arith.constant 0 : index
    %c1_45 = arith.constant 1 : index
    %c0_46 = arith.constant 0 : index
    %61 = vector.load %arg9[%c0_44, %c1_45, %c0_46] : memref<10x10x32xf32, #tpu.memory_space<vmem>>, vector<8x8x32xf32>
    %62 = vector.shape_cast %61 : vector<8x8x32xf32> to vector<64x32xf32>
    %63 = arith.truncf %62 : vector<64x32xf32> to vector<64x32xbf16>
    %c0_47 = arith.constant 0 : index
    %c1_48 = arith.constant 1 : index
    %c0_49 = arith.constant 0 : index
    %c0_50 = arith.constant 0 : index
    %64 = vector.load %arg6[%c0_47, %c1_48, %c0_49, %c0_50] : memref<4x4x4x32xbf16, #tpu.memory_space<vmem>>, vector<1x1x4x32xbf16>
    %65 = vector.shape_cast %64 : vector<1x1x4x32xbf16> to vector<4x32xbf16>
    %cst_51 = arith.constant dense<0.000000e+00> : vector<4x64xf32>
    %66 = tpu.matmul %65, %63, %cst_51 {dimension_numbers = #tpu.dot_dimension_numbers<[1], [1], [0], [0], [0, 0, 1, 0], [], []>} : vector<4x32xbf16>, vector<64x32xbf16>, vector<4x64xf32> -> vector<4x64xf32>
    %67 = arith.addf %60, %66 : vector<4x64xf32>
    %c1_52 = arith.constant 1 : index
    %c0_53 = arith.constant 0 : index
    %c0_54 = arith.constant 0 : index
    %68 = vector.load %arg9[%c1_52, %c0_53, %c0_54] : memref<10x10x32xf32, #tpu.memory_space<vmem>>, vector<8x8x32xf32>
    %69 = vector.shape_cast %68 : vector<8x8x32xf32> to vector<64x32xf32>
    %70 = arith.truncf %69 : vector<64x32xf32> to vector<64x32xbf16>
    %c0_55 = arith.constant 0 : index
    %c2_56 = arith.constant 2 : index
    %c0_57 = arith.constant 0 : index
    %c0_58 = arith.constant 0 : index
    %71 = vector.load %arg6[%c0_55, %c2_56, %c0_57, %c0_58] : memref<4x4x4x32xbf16, #tpu.memory_space<vmem>>, vector<1x1x4x32xbf16>
    %72 = vector.shape_cast %71 : vector<1x1x4x32xbf16> to vector<4x32xbf16>
    %cst_59 = arith.constant dense<0.000000e+00> : vector<4x64xf32>
    %73 = tpu.matmul %72, %70, %cst_59 {dimension_numbers = #tpu.dot_dimension_numbers<[1], [1], [0], [0], [0, 0, 1, 0], [], []>} : vector<4x32xbf16>, vector<64x32xbf16>, vector<4x64xf32> -> vector<4x64xf32>
    %74 = arith.addf %67, %73 : vector<4x64xf32>
    %c1_60 = arith.constant 1 : index
    %c1_61 = arith.constant 1 : index
    %c0_62 = arith.constant 0 : index
    %75 = vector.load %arg9[%c1_60, %c1_61, %c0_62] : memref<10x10x32xf32, #tpu.memory_space<vmem>>, vector<8x8x32xf32>
    %76 = vector.shape_cast %75 : vector<8x8x32xf32> to vector<64x32xf32>
    %77 = arith.truncf %76 : vector<64x32xf32> to vector<64x32xbf16>
    %c0_63 = arith.constant 0 : index
    %c3_64 = arith.constant 3 : index
    %c0_65 = arith.constant 0 : index
    %c0_66 = arith.constant 0 : index
    %78 = vector.load %arg6[%c0_63, %c3_64, %c0_65, %c0_66] : memref<4x4x4x32xbf16, #tpu.memory_space<vmem>>, vector<1x1x4x32xbf16>
    %79 = vector.shape_cast %78 : vector<1x1x4x32xbf16> to vector<4x32xbf16>
    %cst_67 = arith.constant dense<0.000000e+00> : vector<4x64xf32>
    %80 = tpu.matmul %79, %77, %cst_67 {dimension_numbers = #tpu.dot_dimension_numbers<[1], [1], [0], [0], [0, 0, 1, 0], [], []>} : vector<4x32xbf16>, vector<64x32xbf16>, vector<4x64xf32> -> vector<4x64xf32>
    %81 = arith.addf %74, %80 : vector<4x64xf32>
    %c0_68 = arith.constant 0 : index
    %c0_69 = arith.constant 0 : index
    %82 = vector.load %arg7[%c0_68, %c0_69] : memref<4x1xf32, #tpu.memory_space<vmem>>, vector<4x1xf32>
    %83 = vector.broadcast %82 : vector<4x1xf32> to vector<4x64xf32>
    %84 = arith.addf %81, %83 : vector<4x64xf32>
    %c0_70 = arith.constant 0 : index
    %c0_71 = arith.constant 0 : index
    %c0_72 = arith.constant 0 : index
    %85 = vector.load %arg8[%c0_70, %c0_71, %c0_72] : memref<1x4x256xf32, #tpu.memory_space<vmem>>, vector<1x4x64xf32>
    %86 = vector.shape_cast %85 : vector<1x4x64xf32> to vector<4x64xf32>
    %87 = vector.shape_cast %84 : vector<4x64xf32> to vector<1x4x64xf32>
    tpu.vector_store %arg8[%c0_70, %c0_71, %c0_72], %87 {strides = array<i32>} : memref<1x4x256xf32, #tpu.memory_space<vmem>>, vector<1x4x64xf32>,
    %cst_73 = arith.constant 0.000000e+00 : f32
    %88 = vector.broadcast %cst_73 : f32 to vector<4x64xf32>
    %c0_74 = arith.constant 0 : index
    %c1_75 = arith.constant 1 : index
    %c0_76 = arith.constant 0 : index
    %89 = vector.load %arg9[%c0_74, %c1_75, %c0_76] : memref<10x10x32xf32, #tpu.memory_space<vmem>>, vector<8x8x32xf32>
    %90 = vector.shape_cast %89 : vector<8x8x32xf32> to vector<64x32xf32>
    %91 = arith.truncf %90 : vector<64x32xf32> to vector<64x32xbf16>
    %c1_77 = arith.constant 1 : index
    %c0_78 = arith.constant 0 : index
    %c0_79 = arith.constant 0 : index
    %c0_80 = arith.constant 0 : index
    %92 = vector.load %arg6[%c1_77, %c0_78, %c0_79, %c0_80] : memref<4x4x4x32xbf16, #tpu.memory_space<vmem>>, vector<1x1x4x32xbf16>
    %93 = vector.shape_cast %92 : vector<1x1x4x32xbf16> to vector<4x32xbf16>
    %cst_81 = arith.constant dense<0.000000e+00> : vector<4x64xf32>
    %94 = tpu.matmul %93, %91, %cst_81 {dimension_numbers = #tpu.dot_dimension_numbers<[1], [1], [0], [0], [0, 0, 1, 0], [], []>} : vector<4x32xbf16>, vector<64x32xbf16>, vector<4x64xf32> -> vector<4x64xf32>
    %95 = arith.addf %88, %94 : vector<4x64xf32>
    %c0_82 = arith.constant 0 : index
    %c2_83 = arith.constant 2 : index
    %c0_84 = arith.constant 0 : index
    %96 = vector.load %arg9[%c0_82, %c2_83, %c0_84] : memref<10x10x32xf32, #tpu.memory_space<vmem>>, vector<8x8x32xf32>
    %97 = vector.shape_cast %96 : vector<8x8x32xf32> to vector<64x32xf32>
    %98 = arith.truncf %97 : vector<64x32xf32> to vector<64x32xbf16>
    %c1_85 = arith.constant 1 : index
    %c1_86 = arith.constant 1 : index
    %c0_87 = arith.constant 0 : index
    %c0_88 = arith.constant 0 : index
    %99 = vector.load %arg6[%c1_85, %c1_86, %c0_87, %c0_88] : memref<4x4x4x32xbf16, #tpu.memory_space<vmem>>, vector<1x1x4x32xbf16>
    %100 = vector.shape_cast %99 : vector<1x1x4x32xbf16> to vector<4x32xbf16>
    %cst_89 = arith.constant dense<0.000000e+00> : vector<4x64xf32>
    %101 = tpu.matmul %100, %98, %cst_89 {dimension_numbers = #tpu.dot_dimension_numbers<[1], [1], [0], [0], [0, 0, 1, 0], [], []>} : vector<4x32xbf16>, vector<64x32xbf16>, vector<4x64xf32> -> vector<4x64xf32>
    %102 = arith.addf %95, %101 : vector<4x64xf32>
    %c1_90 = arith.constant 1 : index
    %c1_91 = arith.constant 1 : index
    %c0_92 = arith.constant 0 : index
    %103 = vector.load %arg9[%c1_90, %c1_91, %c0_92] : memref<10x10x32xf32, #tpu.memory_space<vmem>>, vector<8x8x32xf32>
    %104 = vector.shape_cast %103 : vector<8x8x32xf32> to vector<64x32xf32>
    %105 = arith.truncf %104 : vector<64x32xf32> to vector<64x32xbf16>
    %c1_93 = arith.constant 1 : index
    %c2_94 = arith.constant 2 : index
    %c0_95 = arith.constant 0 : index
    %c0_96 = arith.constant 0 : index
    %106 = vector.load %arg6[%c1_93, %c2_94, %c0_95, %c0_96] : memref<4x4x4x32xbf16, #tpu.memory_space<vmem>>, vector<1x1x4x32xbf16>
    %107 = vector.shape_cast %106 : vector<1x1x4x32xbf16> to vector<4x32xbf16>
    %cst_97 = arith.constant dense<0.000000e+00> : vector<4x64xf32>
    %108 = tpu.matmul %107, %105, %cst_97 {dimension_numbers = #tpu.dot_dimension_numbers<[1], [1], [0], [0], [0, 0, 1, 0], [], []>} : vector<4x32xbf16>, vector<64x32xbf16>, vector<4x64xf32> -> vector<4x64xf32>
    %109 = arith.addf %102, %108 : vector<4x64xf32>
    %c1_98 = arith.constant 1 : index
    %c2_99 = arith.constant 2 : index
    %c0_100 = arith.constant 0 : index
    %110 = vector.load %arg9[%c1_98, %c2_99, %c0_100] : memref<10x10x32xf32, #tpu.memory_space<vmem>>, vector<8x8x32xf32>
    %111 = vector.shape_cast %110 : vector<8x8x32xf32> to vector<64x32xf32>
    %112 = arith.truncf %111 : vector<64x32xf32> to vector<64x32xbf16>
    %c1_101 = arith.constant 1 : index
    %c3_102 = arith.constant 3 : index
    %c0_103 = arith.constant 0 : index
    %c0_104 = arith.constant 0 : index
    %113 = vector.load %arg6[%c1_101, %c3_102, %c0_103, %c0_104] : memref<4x4x4x32xbf16, #tpu.memory_space<vmem>>, vector<1x1x4x32xbf16>
    %114 = vector.shape_cast %113 : vector<1x1x4x32xbf16> to vector<4x32xbf16>
    %cst_105 = arith.constant dense<0.000000e+00> : vector<4x64xf32>
    %115 = tpu.matmul %114, %112, %cst_105 {dimension_numbers = #tpu.dot_dimension_numbers<[1], [1], [0], [0], [0, 0, 1, 0], [], []>} : vector<4x32xbf16>, vector<64x32xbf16>, vector<4x64xf32> -> vector<4x64xf32>
    %116 = arith.addf %109, %115 : vector<4x64xf32>
    %c0_106 = arith.constant 0 : index
    %c0_107 = arith.constant 0 : index
    %117 = vector.load %arg7[%c0_106, %c0_107] : memref<4x1xf32, #tpu.memory_space<vmem>>, vector<4x1xf32>
    %118 = vector.broadcast %117 : vector<4x1xf32> to vector<4x64xf32>
    %119 = arith.addf %116, %118 : vector<4x64xf32>
    %c0_108 = arith.constant 0 : index
    %c0_109 = arith.constant 0 : index
    %c64 = arith.constant 64 : index
    %120 = vector.load %arg8[%c0_108, %c0_109, %c64] : memref<1x4x256xf32, #tpu.memory_space<vmem>>, vector<1x4x64xf32>
    %121 = vector.shape_cast %120 : vector<1x4x64xf32> to vector<4x64xf32>
    %122 = vector.shape_cast %119 : vector<4x64xf32> to vector<1x4x64xf32>
    tpu.vector_store %arg8[%c0_108, %c0_109, %c64], %122 {strides = array<i32>} : memref<1x4x256xf32, #tpu.memory_space<vmem>>, vector<1x4x64xf32>,
    %cst_110 = arith.constant 0.000000e+00 : f32
    %123 = vector.broadcast %cst_110 : f32 to vector<4x64xf32>
    %c1_111 = arith.constant 1 : index
    %c0_112 = arith.constant 0 : index
    %c0_113 = arith.constant 0 : index
    %124 = vector.load %arg9[%c1_111, %c0_112, %c0_113] : memref<10x10x32xf32, #tpu.memory_space<vmem>>, vector<8x8x32xf32>
    %125 = vector.shape_cast %124 : vector<8x8x32xf32> to vector<64x32xf32>
    %126 = arith.truncf %125 : vector<64x32xf32> to vector<64x32xbf16>
    %c2_114 = arith.constant 2 : index
    %c0_115 = arith.constant 0 : index
    %c0_116 = arith.constant 0 : index
    %c0_117 = arith.constant 0 : index
    %127 = vector.load %arg6[%c2_114, %c0_115, %c0_116, %c0_117] : memref<4x4x4x32xbf16, #tpu.memory_space<vmem>>, vector<1x1x4x32xbf16>
    %128 = vector.shape_cast %127 : vector<1x1x4x32xbf16> to vector<4x32xbf16>
    %cst_118 = arith.constant dense<0.000000e+00> : vector<4x64xf32>
    %129 = tpu.matmul %128, %126, %cst_118 {dimension_numbers = #tpu.dot_dimension_numbers<[1], [1], [0], [0], [0, 0, 1, 0], [], []>} : vector<4x32xbf16>, vector<64x32xbf16>, vector<4x64xf32> -> vector<4x64xf32>
    %130 = arith.addf %123, %129 : vector<4x64xf32>
    %c1_119 = arith.constant 1 : index
    %c1_120 = arith.constant 1 : index
    %c0_121 = arith.constant 0 : index
    %131 = vector.load %arg9[%c1_119, %c1_120, %c0_121] : memref<10x10x32xf32, #tpu.memory_space<vmem>>, vector<8x8x32xf32>
    %132 = vector.shape_cast %131 : vector<8x8x32xf32> to vector<64x32xf32>
    %133 = arith.truncf %132 : vector<64x32xf32> to vector<64x32xbf16>
    %c2_122 = arith.constant 2 : index
    %c1_123 = arith.constant 1 : index
    %c0_124 = arith.constant 0 : index
    %c0_125 = arith.constant 0 : index
    %134 = vector.load %arg6[%c2_122, %c1_123, %c0_124, %c0_125] : memref<4x4x4x32xbf16, #tpu.memory_space<vmem>>, vector<1x1x4x32xbf16>
    %135 = vector.shape_cast %134 : vector<1x1x4x32xbf16> to vector<4x32xbf16>
    %cst_126 = arith.constant dense<0.000000e+00> : vector<4x64xf32>
    %136 = tpu.matmul %135, %133, %cst_126 {dimension_numbers = #tpu.dot_dimension_numbers<[1], [1], [0], [0], [0, 0, 1, 0], [], []>} : vector<4x32xbf16>, vector<64x32xbf16>, vector<4x64xf32> -> vector<4x64xf32>
    %137 = arith.addf %130, %136 : vector<4x64xf32>
    %c2_127 = arith.constant 2 : index
    %c0_128 = arith.constant 0 : index
    %c0_129 = arith.constant 0 : index
    %138 = vector.load %arg9[%c2_127, %c0_128, %c0_129] : memref<10x10x32xf32, #tpu.memory_space<vmem>>, vector<8x8x32xf32>
    %139 = vector.shape_cast %138 : vector<8x8x32xf32> to vector<64x32xf32>
    %140 = arith.truncf %139 : vector<64x32xf32> to vector<64x32xbf16>
    %c2_130 = arith.constant 2 : index
    %c2_131 = arith.constant 2 : index
    %c0_132 = arith.constant 0 : index
    %c0_133 = arith.constant 0 : index
    %141 = vector.load %arg6[%c2_130, %c2_131, %c0_132, %c0_133] : memref<4x4x4x32xbf16, #tpu.memory_space<vmem>>, vector<1x1x4x32xbf16>
    %142 = vector.shape_cast %141 : vector<1x1x4x32xbf16> to vector<4x32xbf16>
    %cst_134 = arith.constant dense<0.000000e+00> : vector<4x64xf32>
    %143 = tpu.matmul %142, %140, %cst_134 {dimension_numbers = #tpu.dot_dimension_numbers<[1], [1], [0], [0], [0, 0, 1, 0], [], []>} : vector<4x32xbf16>, vector<64x32xbf16>, vector<4x64xf32> -> vector<4x64xf32>
    %144 = arith.addf %137, %143 : vector<4x64xf32>
    %c2_135 = arith.constant 2 : index
    %c1_136 = arith.constant 1 : index
    %c0_137 = arith.constant 0 : index
    %145 = vector.load %arg9[%c2_135, %c1_136, %c0_137] : memref<10x10x32xf32, #tpu.memory_space<vmem>>, vector<8x8x32xf32>
    %146 = vector.shape_cast %145 : vector<8x8x32xf32> to vector<64x32xf32>
    %147 = arith.truncf %146 : vector<64x32xf32> to vector<64x32xbf16>
    %c2_138 = arith.constant 2 : index
    %c3_139 = arith.constant 3 : index
    %c0_140 = arith.constant 0 : index
    %c0_141 = arith.constant 0 : index
    %148 = vector.load %arg6[%c2_138, %c3_139, %c0_140, %c0_141] : memref<4x4x4x32xbf16, #tpu.memory_space<vmem>>, vector<1x1x4x32xbf16>
    %149 = vector.shape_cast %148 : vector<1x1x4x32xbf16> to vector<4x32xbf16>
    %cst_142 = arith.constant dense<0.000000e+00> : vector<4x64xf32>
    %150 = tpu.matmul %149, %147, %cst_142 {dimension_numbers = #tpu.dot_dimension_numbers<[1], [1], [0], [0], [0, 0, 1, 0], [], []>} : vector<4x32xbf16>, vector<64x32xbf16>, vector<4x64xf32> -> vector<4x64xf32>
    %151 = arith.addf %144, %150 : vector<4x64xf32>
    %c0_143 = arith.constant 0 : index
    %c0_144 = arith.constant 0 : index
    %152 = vector.load %arg7[%c0_143, %c0_144] : memref<4x1xf32, #tpu.memory_space<vmem>>, vector<4x1xf32>
    %153 = vector.broadcast %152 : vector<4x1xf32> to vector<4x64xf32>
    %154 = arith.addf %151, %153 : vector<4x64xf32>
    %c0_145 = arith.constant 0 : index
    %c0_146 = arith.constant 0 : index
    %c128 = arith.constant 128 : index
    %155 = vector.load %arg8[%c0_145, %c0_146, %c128] : memref<1x4x256xf32, #tpu.memory_space<vmem>>, vector<1x4x64xf32>
    %156 = vector.shape_cast %155 : vector<1x4x64xf32> to vector<4x64xf32>
    %157 = vector.shape_cast %154 : vector<4x64xf32> to vector<1x4x64xf32>
    tpu.vector_store %arg8[%c0_145, %c0_146, %c128], %157 {strides = array<i32>} : memref<1x4x256xf32, #tpu.memory_space<vmem>>, vector<1x4x64xf32>,
    %cst_147 = arith.constant 0.000000e+00 : f32
    %158 = vector.broadcast %cst_147 : f32 to vector<4x64xf32>
    %c1_148 = arith.constant 1 : index
    %c1_149 = arith.constant 1 : index
    %c0_150 = arith.constant 0 : index
    %159 = vector.load %arg9[%c1_148, %c1_149, %c0_150] : memref<10x10x32xf32, #tpu.memory_space<vmem>>, vector<8x8x32xf32>
    %160 = vector.shape_cast %159 : vector<8x8x32xf32> to vector<64x32xf32>
    %161 = arith.truncf %160 : vector<64x32xf32> to vector<64x32xbf16>
    %c3_151 = arith.constant 3 : index
    %c0_152 = arith.constant 0 : index
    %c0_153 = arith.constant 0 : index
    %c0_154 = arith.constant 0 : index
    %162 = vector.load %arg6[%c3_151, %c0_152, %c0_153, %c0_154] : memref<4x4x4x32xbf16, #tpu.memory_space<vmem>>, vector<1x1x4x32xbf16>
    %163 = vector.shape_cast %162 : vector<1x1x4x32xbf16> to vector<4x32xbf16>
    %cst_155 = arith.constant dense<0.000000e+00> : vector<4x64xf32>
    %164 = tpu.matmul %163, %161, %cst_155 {dimension_numbers = #tpu.dot_dimension_numbers<[1], [1], [0], [0], [0, 0, 1, 0], [], []>} : vector<4x32xbf16>, vector<64x32xbf16>, vector<4x64xf32> -> vector<4x64xf32>
    %165 = arith.addf %158, %164 : vector<4x64xf32>
    %c1_156 = arith.constant 1 : index
    %c2_157 = arith.constant 2 : index
    %c0_158 = arith.constant 0 : index
    %166 = vector.load %arg9[%c1_156, %c2_157, %c0_158] : memref<10x10x32xf32, #tpu.memory_space<vmem>>, vector<8x8x32xf32>
    %167 = vector.shape_cast %166 : vector<8x8x32xf32> to vector<64x32xf32>
    %168 = arith.truncf %167 : vector<64x32xf32> to vector<64x32xbf16>
    %c3_159 = arith.constant 3 : index
    %c1_160 = arith.constant 1 : index
    %c0_161 = arith.constant 0 : index
    %c0_162 = arith.constant 0 : index
    %169 = vector.load %arg6[%c3_159, %c1_160, %c0_161, %c0_162] : memref<4x4x4x32xbf16, #tpu.memory_space<vmem>>, vector<1x1x4x32xbf16>
    %170 = vector.shape_cast %169 : vector<1x1x4x32xbf16> to vector<4x32xbf16>
    %cst_163 = arith.constant dense<0.000000e+00> : vector<4x64xf32>
    %171 = tpu.matmul %170, %168, %cst_163 {dimension_numbers = #tpu.dot_dimension_numbers<[1], [1], [0], [0], [0, 0, 1, 0], [], []>} : vector<4x32xbf16>, vector<64x32xbf16>, vector<4x64xf32> -> vector<4x64xf32>
    %172 = arith.addf %165, %171 : vector<4x64xf32>
    %c2_164 = arith.constant 2 : index
    %c1_165 = arith.constant 1 : index
    %c0_166 = arith.constant 0 : index
    %173 = vector.load %arg9[%c2_164, %c1_165, %c0_166] : memref<10x10x32xf32, #tpu.memory_space<vmem>>, vector<8x8x32xf32>
    %174 = vector.shape_cast %173 : vector<8x8x32xf32> to vector<64x32xf32>
    %175 = arith.truncf %174 : vector<64x32xf32> to vector<64x32xbf16>
    %c3_167 = arith.constant 3 : index
    %c2_168 = arith.constant 2 : index
    %c0_169 = arith.constant 0 : index
    %c0_170 = arith.constant 0 : index
    %176 = vector.load %arg6[%c3_167, %c2_168, %c0_169, %c0_170] : memref<4x4x4x32xbf16, #tpu.memory_space<vmem>>, vector<1x1x4x32xbf16>
    %177 = vector.shape_cast %176 : vector<1x1x4x32xbf16> to vector<4x32xbf16>
    %cst_171 = arith.constant dense<0.000000e+00> : vector<4x64xf32>
    %178 = tpu.matmul %177, %175, %cst_171 {dimension_numbers = #tpu.dot_dimension_numbers<[1], [1], [0], [0], [0, 0, 1, 0], [], []>} : vector<4x32xbf16>, vector<64x32xbf16>, vector<4x64xf32> -> vector<4x64xf32>
    %179 = arith.addf %172, %178 : vector<4x64xf32>
    %c2_172 = arith.constant 2 : index
    %c2_173 = arith.constant 2 : index
    %c0_174 = arith.constant 0 : index
    %180 = vector.load %arg9[%c2_172, %c2_173, %c0_174] : memref<10x10x32xf32, #tpu.memory_space<vmem>>, vector<8x8x32xf32>
    %181 = vector.shape_cast %180 : vector<8x8x32xf32> to vector<64x32xf32>
    %182 = arith.truncf %181 : vector<64x32xf32> to vector<64x32xbf16>
    %c3_175 = arith.constant 3 : index
    %c3_176 = arith.constant 3 : index
    %c0_177 = arith.constant 0 : index
    %c0_178 = arith.constant 0 : index
    %183 = vector.load %arg6[%c3_175, %c3_176, %c0_177, %c0_178] : memref<4x4x4x32xbf16, #tpu.memory_space<vmem>>, vector<1x1x4x32xbf16>
    %184 = vector.shape_cast %183 : vector<1x1x4x32xbf16> to vector<4x32xbf16>
    %cst_179 = arith.constant dense<0.000000e+00> : vector<4x64xf32>
    %185 = tpu.matmul %184, %182, %cst_179 {dimension_numbers = #tpu.dot_dimension_numbers<[1], [1], [0], [0], [0, 0, 1, 0], [], []>} : vector<4x32xbf16>, vector<64x32xbf16>, vector<4x64xf32> -> vector<4x64xf32>
    %186 = arith.addf %179, %185 : vector<4x64xf32>
    %c0_180 = arith.constant 0 : index
    %c0_181 = arith.constant 0 : index
    %187 = vector.load %arg7[%c0_180, %c0_181] : memref<4x1xf32, #tpu.memory_space<vmem>>, vector<4x1xf32>
    %188 = vector.broadcast %187 : vector<4x1xf32> to vector<4x64xf32>
    %189 = arith.addf %186, %188 : vector<4x64xf32>
    %c0_182 = arith.constant 0 : index
    %c0_183 = arith.constant 0 : index
    %c192 = arith.constant 192 : index
    %190 = vector.load %arg8[%c0_182, %c0_183, %c192] : memref<1x4x256xf32, #tpu.memory_space<vmem>>, vector<1x4x64xf32>
    %191 = vector.shape_cast %190 : vector<1x4x64xf32> to vector<4x64xf32>
    %192 = vector.shape_cast %189 : vector<4x64xf32> to vector<1x4x64xf32>
    tpu.vector_store %arg8[%c0_182, %c0_183, %c192], %192 {strides = array<i32>} : memref<1x4x256xf32, #tpu.memory_space<vmem>>, vector<1x4x64xf32>,
    return
  }
  func.func @transform_0(%arg0: i32) -> (i32, i32, i32, i32) {
    %c0_i32 = arith.constant 0 : i32
    %c0_i32_0 = arith.constant 0 : i32
    %c0_i32_1 = arith.constant 0 : i32
    %c0_i32_2 = arith.constant 0 : i32
    return %arg0, %c0_i32, %c0_i32_0, %c0_i32_1 : i32, i32, i32, i32
  }
  func.func @transform_1(%arg0: i32) -> (i32, i32, i32) {
    %c0_i32 = arith.constant 0 : i32
    %c0_i32_0 = arith.constant 0 : i32
    %c0_i32_1 = arith.constant 0 : i32
    %c0_i32_2 = arith.constant 0 : i32
    return %c0_i32, %c0_i32_0, %c0_i32_1 : i32, i32, i32
  }
  func.func @transform_2(%arg0: i32) -> (i32, i32) {
    %c0_i32 = arith.constant 0 : i32
    %c0_i32_0 = arith.constant 0 : i32
    %c0_i32_1 = arith.constant 0 : i32
    return %c0_i32, %c0_i32_0 : i32, i32
  }
  func.func @transform_3(%arg0: i32) -> (i32, i32) {
    %c0_i32 = arith.constant 0 : i32
    %c0_i32_0 = arith.constant 0 : i32
    %c0_i32_1 = arith.constant 0 : i32
    return %c0_i32, %c0_i32_0 : i32, i32
  }
  func.func @transform_4(%arg0: i32) -> (i32, i32) {
    %c0_i32 = arith.constant 0 : i32
    %c0_i32_0 = arith.constant 0 : i32
    %c0_i32_1 = arith.constant 0 : i32
    return %c0_i32, %c0_i32_0 : i32, i32
  }
  func.func @transform_5(%arg0: i32) -> (i32, i32, i32, i32) {
    %c0_i32 = arith.constant 0 : i32
    %c0_i32_0 = arith.constant 0 : i32
    %c0_i32_1 = arith.constant 0 : i32
    %c0_i32_2 = arith.constant 0 : i32
    %c0_i32_3 = arith.constant 0 : i32
    return %c0_i32, %c0_i32_0, %c0_i32_1, %c0_i32_2 : i32, i32, i32, i32
  }
  func.func @transform_6(%arg0: i32) -> (i32, i32) {
    %c0_i32 = arith.constant 0 : i32
    %c0_i32_0 = arith.constant 0 : i32
    %c0_i32_1 = arith.constant 0 : i32
    return %c0_i32, %c0_i32_0 : i32, i32
  }
  func.func @transform_7(%arg0: i32) -> (i32, i32, i32) {
    %c0_i32 = arith.constant 0 : i32
    %c0_i32_0 = arith.constant 0 : i32
    %c0_i32_1 = arith.constant 0 : i32
    return %arg0, %c0_i32, %c0_i32_0 : i32, i32, i32
  }
}

</mosaic_0001>

<bundles_post_ra>
// kernel: unet_skip_block_forward.1
= control target key start
LH: loop header
LB: loop body
LE: loop exit
PB: predicated region body
PF: predicated region fallthrough
CT: control target
= control target key end

     0   :  { %s2856_s24 = smov 0   ;;  %s3449_s0 = inlined_call_operand.vmem [shape: f32[2,9,9,16], index: 0, kind: input, shape index: {}]   ;;  %s3450_s1 = inlined_call_operand.vmem [shape: bf16[4,16,8], index: 1, kind: input, shape index: {}]   ;;  %s3451_s2 = inlined_call_operand.vmem [shape: f32[1,8], index: 2, kind: input, shape index: {}]   ;;  %s3452_s3 = inlined_call_operand.vmem [shape: bf16[8,32], index: 3, kind: input, shape index: {}]   ;;  %s3453_s4 = inlined_call_operand.vmem [shape: f32[1,32], index: 4, kind: input, shape index: {}]   ;;  %s3454_s5 = inlined_call_operand.vmem [shape: bf16[4,4,4,32], index: 5, kind: input, shape index: {}]   ;;  %s3455_s6 = inlined_call_operand.vmem [shape: f32[4,1], index: 6, kind: input, shape index: {}]   ;;  %s3456_s7 = inlined_call_operand.vmem [shape: f32[2,4,256], index: 7, kind: output, shape index: {}]  }
   0x1 LB: > { %s2301_s25 = sadd.s32 4294967295, %s2810_s24   ;;  %p2305_p0 = scmp.ge.s32.totalorder %s2810_s24, 1  ;;  %s2810_s24 = sphi %s2856_s24, %s17_s24  }
   0x2   : > { %p237_p1 = scmp.lt.s32.totalorder %s2810_s24, 3 }
   0x4   : > { %p238_p2 = pnand %p2305_p0, %p237_p1 }
   0x5   : > { %p269_p3 = scmp.lt.s32.totalorder (!%p238_p2), %s2301_s25, 1 }
   0x6   : > { %241 = sbr.rel (%p238_p2) target bundleno = 1071 (0x42f), region = 48 }
   0xb   : > { %v2800_v0 = vld [vmem:[%s3450_s1 + $0x8] sm:$0xff]   ;;  %v2870_v1 = vld [vmem:[%s3450_s1] sm:$0xff]   ;;  %s3460_s25 = smov (!%p269_p3, %s2301_s25), 1  ;;  %v2877_v2 = vld [vmem:[%s3450_s1 + $0x10] sm:$0xff]   ;;  %vm403_vm10 = vsmask.f32 3328 }
   0xc   : > { %2782 = vmatprep.subr.bf16.mxu1 %v2800_v0  ;;  %2540 = vmatprep.subr.bf16.mxu0 %v2800_v0  ;;  %s2785_s9 = smul.u32 144, %s3460_s25  ;;  %vm404_vm11 = vsmask.f32 7440  ;;  %vm539_vm13 = vcmask 130048   ;;  %s2408_s19 = sshll.u32 %s3460_s25, 3 }
   0xd   : > { %2783 = vmatpush3.bf16.msra.mxu1 %v2800_v0  ;;  %2541 = vmatpush3.bf16.msra.mxu0 %v2800_v0  ;;  %vm2931_vm12 = vmor %vm403_vm10, %vm404_vm11  ;;  %vm2813_vm10 = vmmov 0   ;;  %s3434_s22 = scalar_lea.vmem %s3456_s7, %s2408_s19  ;;  %s2815_s25 = smov 64  }
   0xe   : > { %2550 = vmatprep.subr.bf16.mxu1 %v2870_v1  ;;  %2560 = vmatprep.subr.bf16.mxu0 %v2877_v2  ;;  %s2885_s12 = scalar_lea.vmem %s3449_s0, %s2785_s9 }
   0xf   : > { %v286_v3 = vld [vmem:[%s2885_s12 + $0x30] sm:$0xff]  ;;  %v287_v4 = vld [vmem:[%s2885_s12 + $0x38] sm:$0x1]  ;;  %v288_v5 = vld [vmem:[%s2885_s12 + $0x40] sm:$0xff] }
  0x10   : > { %v289_v6 = vld [vmem:[%s2885_s12 + $0x48] sm:$0x1]  ;;  %v290_v7 = vld [vmem:[%s2885_s12 + $0x50] sm:$0xff]  ;;  %v291_v8 = vld [vmem:[%s2885_s12 + $0x58] sm:$0x1]  ;;  %vm304_vm0 = vcmp.gt.f32.partialorder %v286_v3, 0.0 }
  0x11   : > { %v292_v9 = vld [vmem:[%s2885_s12 + $0x60] sm:$0xff]  ;;  %v293_v10 = vld [vmem:[%s2885_s12 + $0x68] sm:$0x1]  ;;  %v294_v11 = vld [vmem:[%s2885_s12 + $0x70] sm:$0xff]  ;;  %vm305_vm1 = vcmp.gt.f32.partialorder %v287_v4, 0.0  ;;  %vm306_vm2 = vcmp.gt.f32.partialorder %v288_v5, 0.0 }
  0x12   : > { %v295_v12 = vld [vmem:[%s2885_s12 + $0x78] sm:$0x1]  ;;  %vm307_vm3 = vcmp.gt.f32.partialorder %v289_v6, 0.0  ;;  %vm308_vm4 = vcmp.gt.f32.partialorder %v290_v7, 0.0  ;;  %vm309_vm5 = vcmp.gt.f32.partialorder %v291_v8, 0.0  ;;  %vm310_vm6 = vcmp.gt.f32.partialorder %v292_v9, 0.0 }
  0x13   : > { %vm311_vm7 = vcmp.gt.f32.partialorder %v293_v10, 0.0  ;;  %vm312_vm8 = vcmp.gt.f32.partialorder %v294_v11, 0.0  ;;  %vm313_vm9 = vcmp.gt.f32.partialorder %v295_v12, 0.0  ;;  %v322_v13 = vmul.f32 0.2, %v286_v3 }
  0x14   : > { %v323_v14 = vmul.f32 0.2, %v287_v4  ;;  %v324_v15 = vmul.f32 0.2, %v288_v5  ;;  %v325_v16 = vmul.f32 0.2, %v289_v6 }
  0x15   : > { %v326_v17 = vmul.f32 0.2, %v290_v7  ;;  %v327_v18 = vmul.f32 0.2, %v291_v8  ;;  %v328_v19 = vmul.f32 0.2, %v292_v9  ;;  %v2898_v20 = vsel %vm304_vm0, %v286_v3, %v322_v13 }
  0x16   : > { %v329_v21 = vmul.f32 0.2, %v293_v10  ;;  %v330_v22 = vmul.f32 0.2, %v294_v11  ;;  %v331_v23 = vmul.f32 0.2, %v295_v12  ;;  %v341_v24 = vsel %vm305_vm1, %v287_v4, %v323_v14 }
  0x17   : > { %v2902_v25 = vsel %vm306_vm2, %v288_v5, %v324_v15  ;;  %v343_v26 = vsel %vm307_vm3, %v289_v6, %v325_v16  ;;  %v2906_v27 = vsel %vm308_vm4, %v290_v7, %v326_v17  ;;  %v345_v28 = vsel %vm309_vm5, %v291_v8, %v327_v18  ;;  %v281_v6 = vld [vmem:[%s2885_s12 + $0x8] sm:$0x1]  ;;  %v283_v17 = vld [vmem:[%s2885_s12 + $0x18] sm:$0x1] }
  0x18   : > { %v2910_v29 = vsel %vm310_vm6, %v292_v9, %v328_v19  ;;  %v347_v30 = vsel %vm311_vm7, %v293_v10, %v329_v21  ;;  %v2914_v31 = vsel %vm312_vm8, %v294_v11, %v330_v22  ;;  %v349_v32 = vsel %vm313_vm9, %v295_v12, %v331_v23  ;;  %v280_v11 = vld [vmem:[%s2885_s12] sm:$0xff]  ;;  %v282_v12 = vld [vmem:[%s2885_s12 + $0x10] sm:$0xff] }
  0x19   : > { %v2415_v33 = vpack.c.bf16 %v2898_v20, %v2898_v20  ;;  %v2417_v34 = vpack.c.bf16 %v2902_v25, %v2902_v25  ;;  %v2418_v35 = vpack.c.bf16 %v343_v26, %v343_v26  ;;  %v2416_v36 = vpack.c.bf16 %v341_v24, %v341_v24  ;;  %v284_v23 = vld [vmem:[%s2885_s12 + $0x20] sm:$0xff]  ;;  %v285_v24 = vld [vmem:[%s2885_s12 + $0x28] sm:$0x1] }
  0x1a   : > { %v2419_v37 = vpack.c.bf16 %v2906_v27, %v2906_v27  ;;  %v2420_v38 = vpack.c.bf16 %v345_v28, %v345_v28  ;;  %v2421_v39 = vpack.c.bf16 %v2910_v29, %v2910_v29  ;;  %v2422_v40 = vpack.c.bf16 %v347_v30, %v347_v30 }
  0x1b   : > { %v2423_v41 = vpack.c.bf16 %v2914_v31, %v2914_v31  ;;  %v449_v42 = vshrl.u32 %v2415_v33, 16  ;;  %v452_v43 = vshll.u32 %v2415_v33, 16  ;;  %v2424_v44 = vpack.c.bf16 %v349_v32, %v349_v32 }
  0x1c   : > { %v463_v45 = vshrl.u32 %v2417_v34, 16  ;;  %v466_v46 = vshll.u32 %v2417_v34, 16  ;;  %v472_v47 = vshll.u32 %v2418_v35, 16  ;;  %v477_v50 = vshrl.u32 %v2419_v37, 16 }
  0x1d   : > { %v451_v48 = vrot.slane %v449_v42, 4  ;;  %v454_v49 = vrot.slane %v452_v43, 5  ;;  %v480_v51 = vshll.u32 %v2419_v37, 16  ;;  %v2927_v52 = vshll.u32 %v2416_v36, 16 }
  0x1e   : > { %v465_v53 = vrot.slane %v463_v45, 4  ;;  %v468_v54 = vrot.slane %v466_v46, 5  ;;  %v474_v55 = vrot.slane %v472_v47, 5  ;;  %v479_v57 = vrot.slane %v477_v50, 4 }
  0x1f   : > { %v455_v56 = vor.u32 %v454_v49, %v451_v48  ;;  %v482_v58 = vrot.slane %v480_v51, 5  ;;  %v486_v59 = vshll.u32 %v2420_v38, 16  ;;  %v491_v61 = vshrl.u32 %v2421_v39, 16 }
  0x20   : > { %v469_v60 = vor.u32 %v468_v54, %v465_v53  ;;  %v494_v62 = vshll.u32 %v2421_v39, 16  ;;  %v500_v63 = vshll.u32 %v2422_v40, 16  ;;  %v505_v5 = vshrl.u32 %v2423_v41, 16 }
  0x21   : > { %v483_v3 = vor.u32 %v482_v58, %v479_v57  ;;  %v488_v4 = vrot.slane %v486_v59, 5  ;;  %v460_v7 = vrot.slane %v2927_v52, 5  ;;  %v493_v9 = vrot.slane %v491_v61, 4 }
  0x22   : > { %v470_v8 = vrot.slane %v469_v60, 4  ;;  %v496_v10 = vrot.slane %v494_v62, 5  ;;  %v2939_v13 = vrot.slane %v455_v56, 4  ;;  %v507_v15 = vrot.slane %v505_v5, 4 }
  0x23   : > { %v484_v14 = vrot.slane %v483_v3, 4  ;;  %v508_v16 = vshll.u32 %v2423_v41, 16  ;;  %v502_v21 = vrot.slane %v500_v63, 5  ;;  %v514_v22 = vshll.u32 %v2424_v44, 16 }
  0x24   : > { %v2944_v18 = vsel %vm2931_vm12, %v470_v8, %v474_v55  ;;  %v497_v19 = vor.u32 %v496_v10, %v493_v9  ;;  %vm298_vm14 = vcmp.gt.f32.partialorder %v280_v11, 0.0  ;;  %vm299_vm15 = vcmp.gt.f32.partialorder %v281_v6, 0.0  ;;  %v2803_v55 = vld [vmem:[%s3450_s1 + $0x18] sm:$0xff]  }
  0x25   : > { %v2950_v26 = vsel %vm2931_vm12, %v484_v14, %v488_v4  ;;  %v510_v28 = vrot.slane %v508_v16, 5  ;;  %v516_v32 = vrot.slane %v514_v22, 5  ;;  %vm300_vm0 = vcmp.gt.f32.partialorder %v282_v12, 0.0  ;;  %v296_v22 = vld [vmem:[%s2885_s12 + $0x80] sm:$0xff] }
  0x26   : > { %v498_v30 = vrot.slane %v497_v19, 4  ;;  %v2329_v33 = vcombine.low %v2944_v18, %v2950_v26  ;;  %vm301_vm1 = vcmp.gt.f32.partialorder %v283_v17, 0.0  ;;  %vm302_vm2 = vcmp.gt.f32.partialorder %v284_v23, 0.0 }
  0x27   : > { %v511_v34 = vor.u32 %v510_v28, %v507_v15  ;;  %vm303_vm3 = vcmp.gt.f32.partialorder %v285_v24, 0.0  ;;  %v316_v35 = vmul.f32 0.2, %v280_v11  ;;  %v317_v36 = vmul.f32 0.2, %v281_v6 }
  0x28   : > { %2546 = vmatprep.mubr.msk.bf16.mxu1 %vm539_vm13, %v2329_v33  ;;  %v318_v37 = vmul.f32 0.2, %v282_v12  ;;  %v2957_v38 = vsel %vm2931_vm12, %v498_v30, %v502_v21  ;;  %v319_v40 = vmul.f32 0.2, %v283_v17  ;;  %v320_v41 = vmul.f32 0.2, %v284_v23 }
  0x29   : > { %v512_v39 = vrot.slane %v511_v34, 4  ;;  %v321_v42 = vmul.f32 0.2, %v285_v24  ;;  %v334_v43 = vsel %vm298_vm14, %v280_v11, %v316_v35  ;;  %v335_v44 = vsel %vm299_vm15, %v281_v6, %v317_v36  ;;  %v297_v28 = vld [vmem:[%s2885_s12 + $0x88] sm:$0x1] }
  0x2a   : > { %v2962_v45 = vsel %vm300_vm0, %v282_v12, %v318_v37  ;;  %v337_v47 = vsel %vm301_vm1, %v283_v17, %v319_v40  ;;  %v2970_v48 = vsel %vm302_vm2, %v284_v23, %v320_v41  ;;  %v2409_v49 = vpack.c.bf16 %v334_v43, %v334_v43 }
  0x2b   : > { %v2966_v46 = vsel %vm2931_vm12, %v512_v39, %v516_v32  ;;  %v339_v51 = vsel %vm303_vm3, %v285_v24, %v321_v42  ;;  %v2410_v53 = vpack.c.bf16 %v335_v44, %v335_v44  ;;  %v2411_v54 = vpack.c.bf16 %v2962_v45, %v2962_v45 }
  0x2c   : > { %v2330_v50 = vcombine.low %v2957_v38, %v2966_v46  ;;  %v2412_v56 = vpack.c.bf16 %v337_v47, %v337_v47  ;;  %v2413_v57 = vpack.c.bf16 %v2970_v48, %v2970_v48  ;;  %v2414_v58 = vpack.c.bf16 %v339_v51, %v339_v51 }
  0x2d   : > { %v407_v59 = vshrl.u32 %v2409_v49, 16  ;;  %v410_v60 = vshll.u32 %v2409_v49, 16  ;;  %v416_v61 = vshll.u32 %v2410_v53, 16  ;;  %v421_v62 = vshrl.u32 %v2411_v54, 16 }
  0x2e   : > { %2547 = vmatmul.mubr.msk.bf16.vlgmr.msra.gmra.mxu1 %vm539_vm13, %v2330_v50  ;;  %v424_v63 = vshll.u32 %v2411_v54, 16  ;;  %v430_v4 = vshll.u32 %v2412_v56, 16  ;;  %v435_v5 = vshrl.u32 %v2413_v57, 16  ;;  %v438_v6 = vshll.u32 %v2413_v57, 16 }
  0x2f   : > { %2551 = vmatpush3.bf16.msra.mxu1 %v2870_v1  ;;  %v409_v3 = vrot.slane %v407_v59, 4  ;;  %v412_v8 = vrot.slane %v410_v60, 5  ;;  %v418_v9 = vrot.slane %v416_v61, 5  ;;  %v423_v10 = vrot.slane %v421_v62, 4 }
  0x30   : > { %v426_v11 = vrot.slane %v424_v63, 5  ;;  %2570 = vmatprep.subr.bf16.mxu1 %v2803_v55  ;;  %v432_v12 = vrot.slane %v430_v4, 5  ;;  %v437_v14 = vrot.slane %v435_v5, 4  ;;  %v440_v15 = vrot.slane %v438_v6, 5 }
  0x31   : > { %v444_v16 = vshll.u32 %v2414_v58, 16  ;;  %v413_v17 = vor.u32 %v412_v8, %v409_v3  ;;  %v2425_v21 = vpack.c.bf16 %v2962_v45, %v334_v43  ;;  %v2426_v1 = vpack.c.bf16 %v2898_v20, %v2970_v48 }
  0x32   : > { %v427_v19 = vor.u32 %v426_v11, %v423_v10  ;;  %v441_v23 = vor.u32 %v440_v15, %v437_v14  ;;  %v461_v30 = vsel %vm2931_vm12, %v2939_v13, %v460_v7  ;;  %v2427_v34 = vpack.c.bf16 %v2906_v27, %v2902_v25 }
  0x33   : > { %v446_v24 = vrot.slane %v444_v16, 5  ;;  %v414_v32 = vrot.slane %v413_v17, 4  ;;  %2552 = vmatprep.mubr.msk.bf16.mxu1 %vm539_vm13, %v2425_v21  ;;  %v2429_v36 = vpack.c.bf16 %v2970_v48, %v2962_v45  ;;  %vm314_vm4 = vcmp.gt.f32.partialorder %v296_v22, 0.0 }
  0x34   : > { %v428_v33 = vrot.slane %v427_v19, 4  ;;  %v442_v35 = vrot.slane %v441_v23, 4  ;;  %v332_v37 = vmul.f32 0.2, %v296_v22  ;;  %vm315_vm5 = vcmp.gt.f32.partialorder %v297_v28, 0.0 }
  0x35   : > { %v419_v52 = vsel %vm2931_vm12, %v414_v32, %v418_v9  ;;  %v333_v7 = vmul.f32 0.2, %v297_v28  ;;  %v2428_v45 = vpack.c.bf16 %v2914_v31, %v2910_v29  ;;  %v2430_v54 = vpack.c.bf16 %v2902_v25, %v2898_v20 }
  0x36   : > { %v433_v39 = vsel %vm2931_vm12, %v428_v33, %v432_v12  ;;  %2553 = vmatmul.mubr.msk.bf16.vlgmr.msra.gmra.mxu1 %vm539_vm13, %v2426_v1  ;;  %v447_v13 = vsel %vm2931_vm12, %v442_v35, %v446_v24  ;;  %v350_v41 = vsel %vm314_vm4, %v296_v22, %v332_v37  ;;  %v2361_v58 = vcombine.low %v461_v30, %v2944_v18  ;;  %v947_v18 = vld [vmem:[%s3452_s3] sm:$0xf] }
  0x37   : > { %v2327_v40 = vcombine.low %v419_v52, %v433_v39  ;;  %2571 = vmatpush3.bf16.msra.mxu1 %v2803_v55  ;;  %2556 = vmatprep.mubr.msk.bf16.mxu1 %vm539_vm13, %v2427_v34  ;;  %v2328_v42 = vcombine.low %v447_v13, %v461_v30  ;;  %v2433_v43 = vpack.c.bf16 %v350_v41, %v350_v41  ;;  %vm968_vm6 = vcmask 1043456   ;;  %v2369_v37 = vld [vmem:[%s3451_s2] ss:$0 sm:$0xff] }
  0x38   : > { %v351_v44 = vsel %vm315_vm5, %v297_v28, %v333_v7  ;;  %v2360_v49 = vcombine.low %v433_v39, %v447_v13  ;;  %v2431_v55 = vpack.c.bf16 %v2910_v29, %v2906_v27  ;;  %v2432_v25 = vpack.c.bf16 %v350_v41, %v2914_v31 }
  0x39   : > { %2542 = vmatprep.mubr.msk.bf16.mxu0 %vm539_vm13, %v2327_v40  ;;  %v808_v47 = vshrl.u32 %v2433_v43, 16  ;;  %v811_v48 = vshll.u32 %v2433_v43, 16  ;;  %v2434_v50 = vpack.c.bf16 %v351_v44, %v351_v44  ;;  %v970_v31 = vsel %vm968_vm6, %v947_v18, 0 }
  0x3a   : > { %2543 = vmatmul.mubr.msk.bf16.vlgmr.msra.gmra.mxu0 %vm539_vm13, %v2328_v42  ;;  %vm955_vm7 = vcmask 64512   ;;  %vm1061_vm8 = vcmask 261120   ;;  %vm1063_vm9 = vcmask 254976   ;;  %vm1376_vm3 = vcmask 519168  }
  0x3b   : > { %2561 = vmatpush3.bf16.msra.mxu0 %v2877_v2  ;;  %2562 = vmatprep.mubr.msk.bf16.mxu0 %vm539_vm13, %v2429_v36  ;;  %v810_v51 = vrot.slane %v808_v47, 4  ;;  %v813_v53 = vrot.slane %v811_v48, 5  ;;  %v817_v57 = vshll.u32 %v2434_v50, 16  ;;  %v2362_v2 = vcombine.low %v2950_v26, %v2957_v38 }
  0x3c   : > { %2784 = vmatprep.subr.msk.bf16.mxu0 %vm968_vm6, %v947_v18  ;;  %vm1667_vm4 = vcmask 1043968  }
  0x3d   : > { %v814_v56 = vor.u32 %v813_v53, %v810_v51  ;;  %v819_v20 = vrot.slane %v817_v57, 5 }
  0x3e   : > { %2557 = vmatmul.mubr.msk.bf16.gmra.mxu1 %vm539_vm13, %v2428_v45 }
  0x3f   : > { %2572 = vmatprep.mubr.msk.bf16.mxu1 %vm539_vm13, %v2360_v49  ;;  %v815_v59 = vrot.slane %v814_v56, 4 }
  0x41   : > { %v820_v27 = vsel %vm2931_vm12, %v815_v59, %v819_v20 }
  0x42   : > { %2563 = vmatmul.mubr.msk.bf16.vlgmr.msra.gmra.mxu0 %vm539_vm13, %v2430_v54  ;;  %v2363_v29 = vcombine.low %v2966_v46, %v820_v27 }
  0x43   : > { %2566 = vmatprep.mubr.msk.bf16.mxu0 %vm539_vm13, %v2431_v55  ;;  %2581 = vmatpush3.bf16.msra.mxu0 %v970_v31 }
  0x46   : > { %2573 = vmatmul.mubr.msk.bf16.vlgmr.msra.gmra.mxu1 %vm539_vm13, %v2361_v58 }
  0x47   : > { %2576 = vmatprep.mubr.msk.bf16.mxu1 %vm539_vm13, %v2362_v2 }
  0x4a   : > { %2567 = vmatmul.mubr.msk.bf16.gmra.mxu0 %vm539_vm13, %v2432_v25 }
  0x4e   : > { %2577 = vmatmul.mubr.msk.bf16.gmra.mxu1 %vm539_vm13, %v2363_v29 }
  0xee   : > { %v2548_v26 = vpop.f32.mrf.mxu1 }
  0xf0   : > { %v602_v38 = vpop.f32.mrf.mxu1 }
  0xf2   : > { %v2549_v60 = vpop.f32.mrf.mxu1 }
  0xf4   : > { %v605_v61 = vpop.f32.mrf.mxu1 }
  0xf6   : > { %v2554_v0 = vpop.f32.mrf.mxu1 }
  0xf8   : > { %v673_v62 = vpop.f32.mrf.mxu1 }
  0xfa   : > { %v2544_v63 = vpop.f32.mrf.mxu0  ;;  %v2555_v3 = vpop.f32.mrf.mxu1 }
  0xfb   : > { %v682_v14 = vadd.f32 %v2554_v0, %v2544_v63 }
  0xfc   : > { %v586_v4 = vpop.f32.mrf.mxu0  ;;  %v676_v46 = vpop.f32.mrf.mxu1 }
  0xfd   : > { %v674_v12 = vadd.f32 %v673_v62, %v586_v4 }
  0xfe   : > { %v2545_v5 = vpop.f32.mrf.mxu0  ;;  %v2558_v6 = vpop.f32.mrf.mxu1 }
  0xff   : > { %v685_v17 = vadd.f32 %v2555_v3, %v2545_v5  ;;  %v698_v39 = vadd.f32 %v2558_v6, %v2548_v26 }
 0x100   : > { %v589_v8 = vpop.f32.mrf.mxu0  ;;  %v689_v9 = vpop.f32.mrf.mxu1 }
 0x101   : > { %v677_v22 = vadd.f32 %v676_v46, %v589_v8  ;;  %v690_v7 = vadd.f32 %v689_v9, %v602_v38  ;;  %v2812_v9 = vmov 0.0  }
 0x102   : > { %v2564_v10 = vpop.f32.mrf.mxu0  ;;  %v2559_v11 = vpop.f32.mrf.mxu1  ;;  %1069 = vst.msk [vmem:[#allocation2 + $0x30] sm:$0xff] %vm1061_vm8, %v2812_v9  ;;  %1062 = vst.msk [vmem:[#allocation2] sm:$0xff] %vm1061_vm8, %v2812_v9  ;;  %2590 = vmatprep.subr.bf16.mxu1 %v2812_v9  ;;  %2602 = vmatprep.subr.bf16.mxu0 %v2812_v9 }
 0x103   : > { %v798_v23 = vadd.f32 %v2564_v10, %v682_v14  ;;  %v701_v41 = vadd.f32 %v2559_v11, %v2549_v60  ;;  %1070 = vst.msk [vmem:[#allocation2 + $0x38] sm:$0x3] %vm1063_vm9, %v2812_v9  ;;  %1064 = vst.msk [vmem:[#allocation2 + $0x8] sm:$0x3] %vm1063_vm9, %v2812_v9  ;;  %2598 = vmatprep.mubr.msk.bf16.mxu1 %vm2813_vm10, %v2812_v9  ;;  %v2370_v10 = vld [vmem:[%s3453_s4] ss:$0 sm:$0xff] }
 0x104   : > { %v765_v15 = vpop.f32.mrf.mxu0  ;;  %v692_v16 = vpop.f32.mrf.mxu1  ;;  %1065 = vst.msk [vmem:[#allocation2 + $0x10] sm:$0xff] %vm1061_vm8, %v2812_v9  ;;  %1067 = vst.msk [vmem:[#allocation2 + $0x20] sm:$0xff] %vm1061_vm8, %v2812_v9 }
 0x105   : > { %v796_v1 = vadd.f32 %v765_v15, %v674_v12  ;;  %v693_v49 = vadd.f32 %v692_v16, %v605_v61  ;;  %1066 = vst.msk [vmem:[#allocation2 + $0x18] sm:$0x3] %vm1063_vm9, %v2812_v9  ;;  %1068 = vst.msk [vmem:[#allocation2 + $0x28] sm:$0x3] %vm1063_vm9, %v2812_v9 }
 0x106   : > { %v2565_v19 = vpop.f32.mrf.mxu0  ;;  %v2574_v21 = vpop.f32.mrf.mxu1  ;;  %1071 = vst.msk [vmem:[#allocation2 + $0x40] sm:$0xff] %vm1061_vm8, %v2812_v9  ;;  %1073 = vst.msk [vmem:[#allocation2 + $0x50] sm:$0xff] %vm1061_vm8, %v2812_v9 }
 0x107   : > { %v799_v30 = vadd.f32 %v2565_v19, %v685_v17  ;;  %v914_v34 = vadd.f32 %v2574_v21, %v798_v23  ;;  %1072 = vst.msk [vmem:[#allocation2 + $0x48] sm:$0x3] %vm1063_vm9, %v2812_v9  ;;  %1074 = vst.msk [vmem:[#allocation2 + $0x58] sm:$0x3] %vm1063_vm9, %v2812_v9 }
 0x108   : > { %v768_v24 = vpop.f32.mrf.mxu0  ;;  %v881_v28 = vpop.f32.mrf.mxu1  ;;  %1075 = vst.msk [vmem:[#allocation2 + $0x60] sm:$0xff] %vm1061_vm8, %v2812_v9  ;;  %1077 = vst.msk [vmem:[#allocation2 + $0x70] sm:$0xff] %vm1061_vm8, %v2812_v9 }
 0x109   : > { %v912_v32 = vadd.f32 %v881_v28, %v796_v1  ;;  %v797_v36 = vadd.f32 %v768_v24, %v677_v22  ;;  %v929_v47 = vadd.f32 %v2369_v37, %v914_v34  ;;  %1076 = vst.msk [vmem:[#allocation2 + $0x68] sm:$0x3] %vm1063_vm9, %v2812_v9  ;;  %1078 = vst.msk [vmem:[#allocation2 + $0x78] sm:$0x3] %vm1063_vm9, %v2812_v9 }
 0x10a   : > { %v2568_v33 = vpop.f32.mrf.mxu0  ;;  %v2575_v35 = vpop.f32.mrf.mxu1  ;;  %1079 = vst.msk [vmem:[#allocation2 + $0x80] sm:$0xff] %vm1061_vm8, %v2812_v9  ;;  %1081 = vst.msk [vmem:[#allocation2 + $0x90] sm:$0xff] %vm1061_vm8, %v2812_v9 }
 0x10b   : > { %v915_v52 = vadd.f32 %v2575_v35, %v799_v30  ;;  %v927_v42 = vadd.f32 %v2369_v37, %v912_v32  ;;  %v802_v51 = vadd.f32 %v2568_v33, %v698_v39  ;;  %v937_v59 = vmax.f32 %v929_v47, 0.0  ;;  %1080 = vst.msk [vmem:[#allocation2 + $0x88] sm:$0x3] %vm1063_vm9, %v2812_v9  ;;  %1082 = vst.msk [vmem:[#allocation2 + $0x98] sm:$0x3] %vm1063_vm9, %v2812_v9 }
 0x10c   : > { %v781_v13 = vpop.f32.mrf.mxu0  ;;  %v884_v40 = vpop.f32.mrf.mxu1 }
 0x10d   : > { %v930_v43 = vadd.f32 %v2369_v37, %v915_v52  ;;  %v913_v44 = vadd.f32 %v884_v40, %v797_v36  ;;  %v800_v53 = vadd.f32 %v781_v13, %v690_v7  ;;  %v935_v58 = vmax.f32 %v927_v42, 0.0 }
 0x10e   : > { %v2569_v45 = vpop.f32.mrf.mxu0  ;;  %v2578_v48 = vpop.f32.mrf.mxu1 }
 0x10f   : > { %v928_v50 = vadd.f32 %v2369_v37, %v913_v44  ;;  %v938_v55 = vmax.f32 %v930_v43, 0.0  ;;  %v803_v57 = vadd.f32 %v2569_v45, %v701_v41  ;;  %v918_v20 = vadd.f32 %v2578_v48, %v802_v51 }
 0x110   : > { %v784_v54 = vpop.f32.mrf.mxu0  ;;  %v897_v56 = vpop.f32.mrf.mxu1 }
 0x111   : > { %v936_v2 = vmax.f32 %v928_v50, 0.0  ;;  %v916_v25 = vadd.f32 %v897_v56, %v800_v53  ;;  %v801_v29 = vadd.f32 %v784_v54, %v693_v49  ;;  %v944_v26 = vpack.c.bf16 %v938_v55, %v937_v59  ;;  %v1369_v59 = vld [vmem:[%s3455_s6] sm:$0xf] }
 0x112   : > { %v2579_v27 = vpop.f32.mrf.mxu1  ;;  %v933_v62 = vadd.f32 %v2369_v37, %v918_v20 }
 0x113   : > { %v943_v18 = vpack.c.bf16 %v936_v2, %v935_v58  ;;  %v919_v31 = vadd.f32 %v2579_v27, %v803_v57  ;;  %v931_v60 = vadd.f32 %v2369_v37, %v916_v25  ;;  %v2814_v27 = vmov 0  }
 0x114   : > { %v900_v38 = vpop.f32.mrf.mxu1  ;;  %v941_v5 = vmax.f32 %v933_v62, 0.0  ;;  %2799 = vset.pattern.permute.xlu1 %v2814_v27  ;;  %2798 = vset.pattern.permute.xlu0 %v2814_v27 }
 0x115   : > { %v934_v61 = vadd.f32 %v2369_v37, %v919_v31  ;;  %v917_v0 = vadd.f32 %v900_v38, %v801_v29  ;;  %2582 = vmatprep.mubr.msk.bf16.mxu0 %vm955_vm7, %v943_v18  ;;  %v939_v4 = vmax.f32 %v931_v60, 0.0  ;;  %1372 = vperm.xlu1 %2799, %v1369_v59  }
 0x116   : > { %2583 = vmatmul.mubr.msk.bf16.vlgmr.msra.gmra.mxu0 %vm955_vm7, %v944_v26 }
 0x117   : > { %v932_v63 = vadd.f32 %v2369_v37, %v917_v0  ;;  %v942_v3 = vmax.f32 %v934_v61, 0.0 }
 0x119   : > { %v940_v46 = vmax.f32 %v932_v63, 0.0  ;;  %v946_v8 = vpack.c.bf16 %v942_v3, %v941_v5 }
 0x11b   : > { %v945_v6 = vpack.c.bf16 %v940_v46, %v939_v4  ;;  %v1105_v46 = vld [vmem:[#allocation2 + $0x1] sm:$0xff] }
 0x11d   : > { %2586 = vmatprep.mubr.msk.bf16.mxu0 %vm955_vm7, %v945_v6  ;;  %v1092_v6 = vld [vmem:[#allocation2] sm:$0xff] }
 0x11e   : > { %2587 = vmatmul.mubr.msk.bf16.gmra.mxu0 %vm955_vm7, %v946_v8 }
 0x11f   : > { %2610 = vmatprep.mubr.msk.bf16.mxu0 %vm2813_vm10, %v2812_v9 }
 0x1d6   : > { %v2584_v11 = vpop.f32.mrf.mxu0 }
 0x1d7   : > { %v1015_v12 = vadd.f32 %v2584_v11, %v2370_v10 }
 0x1d8   : > { %v1006_v14 = vpop.f32.mrf.mxu0 }
 0x1d9   : > { %vm1039_vm11 = vcmp.gt.f32.partialorder %v1015_v12, 0.0  ;;  %v1047_v15 = vmul.f32 0.2, %v1015_v12  ;;  %v1007_v16 = vadd.f32 %v2370_v10, %v1006_v14 }
 0x1da   : > { %v2585_v17 = vpop.f32.mrf.mxu0 }
 0x1db   : > { %v1055_v19 = vsel %vm1039_vm11, %v1015_v12, %v1047_v15  ;;  %vm1037_vm12 = vcmp.gt.f32.partialorder %v1007_v16, 0.0  ;;  %v1045_v21 = vmul.f32 0.2, %v1007_v16  ;;  %v1018_v1 = vadd.f32 %v2585_v17, %v2370_v10 }
 0x1dc   : > { %1086 = vst.msk [vmem:[#allocation2 + $0x31] sm:$0xff] %vm1061_vm8, %v1055_v19  ;;  %v1009_v22 = vpop.f32.mrf.mxu0 }
 0x1dd   : > { %v1053_v23 = vsel %vm1037_vm12, %v1007_v16, %v1045_v21  ;;  %vm1040_vm13 = vcmp.gt.f32.partialorder %v1018_v1, 0.0  ;;  %v1048_v24 = vmul.f32 0.2, %v1018_v1  ;;  %v1010_v28 = vadd.f32 %v2370_v10, %v1009_v22  ;;  %v2375_v21 = vld [vmem:[%s3454_s5 + $0x2] sm:$0x3] }
 0x1de   : > { %1084 = vst.msk [vmem:[#allocation2 + $0x11] sm:$0xff] %vm1061_vm8, %v1053_v23  ;;  %v2588_v30 = vpop.f32.mrf.mxu0 }
 0x1df   : > { %v1056_v32 = vsel %vm1040_vm13, %v1018_v1, %v1048_v24  ;;  %vm1038_vm14 = vcmp.gt.f32.partialorder %v1010_v28, 0.0  ;;  %v1046_v33 = vmul.f32 0.2, %v1010_v28  ;;  %v1031_v34 = vadd.f32 %v2588_v30, %v2370_v10  ;;  %v1104_v1 = vld [vmem:[%s3454_s5] sm:$0x3] }
 0x1e0   : > { %1087 = vst.msk [vmem:[#allocation2 + $0x41] sm:$0xff] %vm1061_vm8, %v1056_v32  ;;  %v1022_v35 = vpop.f32.mrf.mxu0 }
 0x1e1   : > { %v1054_v36 = vsel %vm1038_vm14, %v1010_v28, %v1046_v33  ;;  %vm1043_vm15 = vcmp.gt.f32.partialorder %v1031_v34, 0.0  ;;  %v1051_v37 = vmul.f32 0.2, %v1031_v34  ;;  %v1023_v52 = vadd.f32 %v2370_v10, %v1022_v35 }
 0x1e2   : > { %1085 = vst.msk [vmem:[#allocation2 + $0x21] sm:$0xff] %vm1061_vm8, %v1054_v36  ;;  %v2589_v39 = vpop.f32.mrf.mxu0 }
 0x1e3   : > { %v1059_v7 = vsel %vm1043_vm15, %v1031_v34, %v1051_v37  ;;  %vm1041_vm0 = vcmp.gt.f32.partialorder %v1023_v52, 0.0  ;;  %v1049_v13 = vmul.f32 0.2, %v1023_v52  ;;  %v1034_v40 = vadd.f32 %v2589_v39, %v2370_v10  ;;  %v1108_v61 = vld [vmem:[#allocation2 + $0x31] sm:$0xff] }
 0x1e4   : > { %1090 = vst.msk [vmem:[#allocation2 + $0x71] sm:$0xff] %vm1061_vm8, %v1059_v7  ;;  %v1025_v41 = vpop.f32.mrf.mxu0  ;;  %v1095_v0 = vld [vmem:[#allocation2 + $0x30] sm:$0xff] }
 0x1e5   : > { %v1057_v42 = vsel %vm1041_vm0, %v1023_v52, %v1049_v13  ;;  %vm1044_vm1 = vcmp.gt.f32.partialorder %v1034_v40, 0.0  ;;  %v1052_v43 = vmul.f32 0.2, %v1034_v40  ;;  %v1026_v44 = vadd.f32 %v2370_v10, %v1025_v41  ;;  %v1106_v5 = vld [vmem:[#allocation2 + $0x11] sm:$0xff] }
 0x1e6   : > { %1088 = vst.msk [vmem:[#allocation2 + $0x51] sm:$0xff] %vm1061_vm8, %v1057_v42  ;;  %v1093_v8 = vld [vmem:[#allocation2 + $0x10] sm:$0xff]  ;;  %v1113_v10 = vpack.c.bf16 %v1106_v5, %v1105_v46  ;;  %v2378_v42 = vld [vmem:[%s3454_s5 + $0x4] sm:$0x3] }
 0x1e7   : > { %v1060_v45 = vsel %vm1044_vm1, %v1034_v40, %v1052_v43  ;;  %vm1042_vm2 = vcmp.gt.f32.partialorder %v1026_v44, 0.0  ;;  %v1050_v47 = vmul.f32 0.2, %v1026_v44  ;;  %v3123_v20 = vld [vmem:[#allocation2 + $0x41] sm:$0xff]  ;;  %v1100_v11 = vpack.c.bf16 %v1093_v8, %v1092_v6  ;;  %v2388_v6 = vld [vmem:[%s3454_s5 + $0xe] sm:$0x3] }
 0x1e8   : > { %1091 = vst.msk [vmem:[#allocation2 + $0x81] sm:$0xff] %vm1061_vm8, %v1060_v45  ;;  %v3125_v25 = vld [vmem:[#allocation2 + $0x40] sm:$0xff]  ;;  %v3151_v12 = vsel %vm1061_vm8, %v1113_v10, 0  ;;  %v1308_v34 = vpack.c.bf16 %v3123_v20, %v1108_v61  ;;  %v1815_v10 = vld [vmem:[#allocation2 + $0x90] sm:$0xff] }
 0x1e9   : > { %v1058_v48 = vsel %vm1042_vm2, %v1026_v44, %v1050_v47  ;;  %v1107_v38 = vld [vmem:[#allocation2 + $0x21] sm:$0xff]  ;;  %v1178_v14 = vsel %vm1061_vm8, %v1100_v11, 0  ;;  %v1238_v33 = vpack.c.bf16 %v3125_v25, %v1095_v0  ;;  %v1885_v11 = vld [vmem:[#allocation2 + $0x91] sm:$0xff] }
 0x1ea   : > { %1089 = vst.msk [vmem:[#allocation2 + $0x61] sm:$0xff] %vm1061_vm8, %v1058_v48  ;;  %v1094_v60 = vld [vmem:[#allocation2 + $0x20] sm:$0xff]  ;;  %v1114_v62 = vpack.c.bf16 %v1108_v61, %v1107_v38  ;;  %v3205_v36 = vsel %vm1061_vm8, %v1308_v34, 0  ;;  %v1307_v52 = vpack.c.bf16 %v1107_v38, %v1106_v5  ;;  %v2386_v5 = vld [vmem:[%s3454_s5 + $0xc] sm:$0x3] }
 0x1eb   : > { %v3099_v49 = vld [vmem:[#allocation2 + $0x71] sm:$0xff]  ;;  %v1101_v63 = vpack.c.bf16 %v1095_v0, %v1094_v60  ;;  %v3202_v35 = vsel %vm1061_vm8, %v1238_v33, 0  ;;  %v1237_v37 = vpack.c.bf16 %v1094_v60, %v1093_v8  ;;  %v2380_v43 = vld [vmem:[%s3454_s5 + $0x6] sm:$0x3]  ;;  %v1656_v47 = vld [vmem:[%s3455_s6] sm:$0xf] }
 0x1ec   : > { %v1099_v53 = vld [vmem:[#allocation2 + $0x70] sm:$0xff]  ;;  %v3141_v3 = vsel %vm1061_vm8, %v1114_v62, 0  ;;  %v3215_v7 = vsel %vm1061_vm8, %v1307_v52, 0  ;;  %v1396_v48 = vld [vmem:[#allocation2 + $0x42] sm:$0xff]  ;;  %1659 = vperm.xlu0 %2798, %v1656_v47   ;;  %v2404_v52 = vld [vmem:[%s3454_s5 + $0x1e] sm:$0x3] }
 0x1ed   : > { %v3116_v58 = vld [vmem:[#allocation2 + $0x51] sm:$0xff]  ;;  %v3144_v4 = vsel %vm1061_vm8, %v1101_v63, 0  ;;  %v3212_v39 = vsel %vm1061_vm8, %v1237_v37, 0  ;;  %v1948_v8 = vld [vmem:[%s3455_s6] sm:$0xf] }
 0x1ee   : > { %v1097_v2 = vld [vmem:[#allocation2 + $0x50] sm:$0xff]  ;;  %v1115_v29 = vpack.c.bf16 %v3116_v58, %v3123_v20  ;;  %1951 = vperm.xlu1 %2799, %v1948_v8  }
 0x1ef   : > { %v1102_v18 = vpack.c.bf16 %v1097_v2, %v3125_v25  ;;  %v3155_v15 = vld [vmem:[#allocation2 + $0x80] sm:$0xff]  ;;  %v1399_v40 = vld [vmem:[#allocation2 + $0x72] sm:$0xff] }
 0x1f0   : > { %v3131_v31 = vsel %vm1061_vm8, %v1115_v29, 0  ;;  %v3157_v16 = vld [vmem:[#allocation2 + $0x81] sm:$0xff]  ;;  %v1240_v17 = vpack.c.bf16 %v3155_v15, %v1099_v53  ;;  %v1397_v45 = vld [vmem:[#allocation2 + $0x52] sm:$0xff]  ;;  %v2383_v29 = vld [vmem:[%s3454_s5 + $0xa] sm:$0x3] }
 0x1f1   : > { %v3101_v50 = vld [vmem:[#allocation2 + $0x61] sm:$0xff]  ;;  %v3134_v26 = vsel %vm1061_vm8, %v1102_v18, 0  ;;  %v1310_v19 = vpack.c.bf16 %v3157_v16, %v3099_v49 }
 0x1f2   : > { %v3103_v51 = vld [vmem:[#allocation2 + $0x60] sm:$0xff]  ;;  %v1116_v54 = vpack.c.bf16 %v3099_v49, %v3101_v50  ;;  %v3173_v22 = vsel %vm1061_vm8, %v1240_v17, 0  ;;  %v1309_v28 = vpack.c.bf16 %v3101_v50, %v3116_v58  ;;  %v1402_v49 = vpack.c.bf16 %v1397_v45, %v1396_v48  ;;  %v2382_v18 = vld [vmem:[%s3454_s5 + $0x8] sm:$0x3]  ;;  %v2391_v17 = vld [vmem:[%s3454_s5 + $0x12] sm:$0x3] }
 0x1f3   : > { %v1103_v55 = vpack.c.bf16 %v1099_v53, %v3103_v51  ;;  %v3176_v23 = vsel %vm1061_vm8, %v1310_v19, 0  ;;  %v1239_v24 = vpack.c.bf16 %v3103_v51, %v1097_v2  ;;  %v1398_v13 = vld [vmem:[#allocation2 + $0x62] sm:$0xff]  ;;  %v1395_v53 = vld [vmem:[#allocation2 + $0x32] sm:$0xff]  ;;  %v2390_v19 = vld [vmem:[%s3454_s5 + $0x10] sm:$0x3] }
 0x1f4   : > { %v3109_v56 = vsel %vm1061_vm8, %v1116_v54, 0  ;;  %v3193_v32 = vsel %vm1061_vm8, %v1309_v28, 0  ;;  %v1403_v41 = vpack.c.bf16 %v1399_v40, %v1398_v13  ;;  %v3244_v50 = vsel %vm1061_vm8, %v1402_v49, 0  ;;  %v1394_v51 = vld [vmem:[#allocation2 + $0x22] sm:$0xff]  ;;  %v1393_v2 = vld [vmem:[#allocation2 + $0x12] sm:$0xff] }
 0x1f5   : > { %v3112_v57 = vsel %vm1061_vm8, %v1103_v55, 0  ;;  %2591 = vmatpush3.bf16.xpose.msra.mxu1 %v3109_v56  ;;  %v3190_v30 = vsel %vm1061_vm8, %v1239_v24, 0  ;;  %v1401_v54 = vpack.c.bf16 %v1395_v53, %v1394_v51  ;;  %v1392_v58 = vld [vmem:[#allocation2 + $0x2] sm:$0xff]  ;;  %v1596_v60 = vpack.c.bf16 %v1398_v13, %v1397_v45  ;;  %v1373_v13 = vpop.permute.xlu1 %1372 }
 0x1f6   : > { %2603 = vmatpush3.bf16.xpose.msra.mxu0 %v3112_v57  ;;  %2592 = vmatprep.subr.bf16.mxu1 %v2812_v9  ;;  %v3230_v44 = vsel %vm1061_vm8, %v1403_v41, 0  ;;  %v1400_v59 = vpack.c.bf16 %v1393_v2, %v1392_v58  ;;  %v3259_v25 = vld [vmem:[#allocation2 + $0x82] sm:$0xff]  ;;  %v1595_v0 = vpack.c.bf16 %v1396_v48, %v1395_v53  ;;  %v1594_v63 = vpack.c.bf16 %v1394_v51, %v1393_v2 }
 0x1f7   : > { %2604 = vmatprep.subr.bf16.mxu0 %v2812_v9  ;;  %v3251_v55 = vsel %vm1061_vm8, %v1401_v54, 0  ;;  %v1597_v27 = vpack.c.bf16 %v3259_v25, %v1399_v40  ;;  %v3284_v61 = vsel %vm1061_vm8, %v1596_v60, 0 }
 0x1f8   : > { %v1410_v20 = vsel %vm1061_vm8, %v1400_v59, 0  ;;  %v3291_v62 = vsel %vm1061_vm8, %v1595_v0, 0  ;;  %v3298_v46 = vsel %vm1061_vm8, %v1594_v63, 0 }
 0x1f9   : > { %v3273_v38 = vsel %vm1061_vm8, %v1597_v27, 0 }
 0x1fd   : > { %2593 = vmatpush3.bf16.xpose.msra.mxu1 %v3131_v31 }
 0x1fe   : > { %2605 = vmatpush3.bf16.xpose.msra.mxu0 %v3134_v26  ;;  %2594 = vmatprep.subr.bf16.mxu1 %v2812_v9 }
 0x1ff   : > { %2606 = vmatprep.subr.bf16.mxu0 %v2812_v9 }
 0x205   : > { %2595 = vmatpush3.bf16.xpose.msra.mxu1 %v3141_v3 }
 0x206   : > { %2607 = vmatpush3.bf16.xpose.msra.mxu0 %v3144_v4  ;;  %2596 = vmatprep.subr.bf16.mxu1 %v2812_v9 }
 0x207   : > { %2608 = vmatprep.subr.bf16.mxu0 %v2812_v9 }
 0x20d   : > { %2597 = vmatpush3.bf16.xpose.msra.mxu1 %v3151_v12 }
 0x20e   : > { %2609 = vmatpush3.bf16.xpose.msra.mxu0 %v1178_v14  ;;  %2614 = vmatprep.subr.bf16.mxu1 %v2812_v9  ;;  %v1889_v14 = vpack.c.bf16 %v1885_v11, %v3157_v16 }
 0x20f   : > { %2626 = vmatprep.subr.bf16.mxu0 %v2812_v9 }
 0x214   : > { %2599 = vmatmul.mubr.msk.bf16.vlgmr.msra.gmra.mxu1 %vm1061_vm8, %v2375_v21 }
 0x215   : > { %2611 = vmatmul.mubr.msk.bf16.vlgmr.msra.gmra.mxu0 %vm1061_vm8, %v1104_v1  ;;  %2615 = vmatpush3.bf16.xpose.msra.mxu1 %v3173_v22  ;;  %v1905_v1 = vsel %vm1061_vm8, %v1889_v14, 0 }
 0x216   : > { %2627 = vmatpush3.bf16.xpose.msra.mxu0 %v3176_v23  ;;  %2616 = vmatprep.subr.bf16.mxu1 %v2812_v9 }
 0x217   : > { %2628 = vmatprep.subr.bf16.mxu0 %v2812_v9  ;;  %2622 = vmatprep.mubr.msk.bf16.mxu1 %vm2813_vm10, %v2812_v9 }
 0x218   : > { %2634 = vmatprep.mubr.msk.bf16.mxu0 %vm2813_vm10, %v2812_v9 }
 0x21d   : > { %2617 = vmatpush3.bf16.xpose.msra.mxu1 %v3190_v30 }
 0x21e   : > { %2629 = vmatpush3.bf16.xpose.msra.mxu0 %v3193_v32  ;;  %2618 = vmatprep.subr.bf16.mxu1 %v2812_v9 }
 0x21f   : > { %2630 = vmatprep.subr.bf16.mxu0 %v2812_v9 }
 0x225   : > { %2619 = vmatpush3.bf16.xpose.msra.mxu1 %v3202_v35 }
 0x226   : > { %2631 = vmatpush3.bf16.xpose.msra.mxu0 %v3205_v36  ;;  %2620 = vmatprep.subr.bf16.mxu1 %v2812_v9 }
 0x227   : > { %2632 = vmatprep.subr.bf16.mxu0 %v2812_v9 }
 0x22d   : > { %2621 = vmatpush3.bf16.xpose.msra.mxu1 %v3212_v39 }
 0x22e   : > { %2633 = vmatpush3.bf16.xpose.msra.mxu0 %v3215_v7  ;;  %2638 = vmatprep.subr.bf16.mxu1 %v2812_v9 }
 0x22f   : > { %2650 = vmatprep.subr.bf16.mxu0 %v2812_v9 }
 0x234   : > { %2623 = vmatmul.mubr.msk.bf16.vlgmr.msra.gmra.mxu1 %vm1061_vm8, %v2378_v42 }
 0x235   : > { %2635 = vmatmul.mubr.msk.bf16.vlgmr.msra.gmra.mxu0 %vm1061_vm8, %v2380_v43  ;;  %2639 = vmatpush3.bf16.xpose.msra.mxu1 %v3230_v44 }
 0x236   : > { %2651 = vmatpush3.bf16.xpose.msra.mxu0 %v3109_v56  ;;  %2640 = vmatprep.subr.bf16.mxu1 %v2812_v9 }
 0x237   : > { %2652 = vmatprep.subr.bf16.mxu0 %v2812_v9  ;;  %2646 = vmatprep.mubr.msk.bf16.mxu1 %vm2813_vm10, %v2812_v9 }
 0x238   : > { %2658 = vmatprep.mubr.msk.bf16.mxu0 %vm2813_vm10, %v2812_v9 }
 0x23d   : > { %2641 = vmatpush3.bf16.xpose.msra.mxu1 %v3244_v50 }
 0x23e   : > { %2653 = vmatpush3.bf16.xpose.msra.mxu0 %v3131_v31  ;;  %2642 = vmatprep.subr.bf16.mxu1 %v2812_v9 }
 0x23f   : > { %2654 = vmatprep.subr.bf16.mxu0 %v2812_v9 }
 0x245   : > { %2643 = vmatpush3.bf16.xpose.msra.mxu1 %v3251_v55 }
 0x246   : > { %2655 = vmatpush3.bf16.xpose.msra.mxu0 %v3141_v3  ;;  %2644 = vmatprep.subr.bf16.mxu1 %v2812_v9 }
 0x247   : > { %2656 = vmatprep.subr.bf16.mxu0 %v2812_v9 }
 0x24d   : > { %2645 = vmatpush3.bf16.xpose.msra.mxu1 %v1410_v20 }
 0x24e   : > { %2657 = vmatpush3.bf16.xpose.msra.mxu0 %v3151_v12  ;;  %2662 = vmatprep.subr.bf16.mxu1 %v2812_v9  ;;  %v1819_v12 = vpack.c.bf16 %v1815_v10, %v3155_v15  ;;  %v2234_v15 = vld [vmem:[%s3455_s6] sm:$0xf] }
 0x24f   : > { %2674 = vmatprep.subr.bf16.mxu0 %v2812_v9  ;;  %2237 = vperm.xlu0 %2798, %v2234_v15  }
 0x250   : > { %v1835_v21 = vsel %vm1061_vm8, %v1819_v12, 0 }
 0x254   : > { %2647 = vmatmul.mubr.msk.bf16.vlgmr.msra.gmra.mxu1 %vm1061_vm8, %v2383_v29 }
 0x255   : > { %2659 = vmatmul.mubr.msk.bf16.vlgmr.msra.gmra.mxu0 %vm1061_vm8, %v2382_v18  ;;  %2663 = vmatpush3.bf16.xpose.msra.mxu1 %v3176_v23 }
 0x256   : > { %2675 = vmatpush3.bf16.xpose.msra.mxu0 %v3273_v38  ;;  %2664 = vmatprep.subr.bf16.mxu1 %v2812_v9 }
 0x257   : > { %2676 = vmatprep.subr.bf16.mxu0 %v2812_v9  ;;  %2670 = vmatprep.mubr.msk.bf16.mxu1 %vm2813_vm10, %v2812_v9 }
 0x258   : > { %2682 = vmatprep.mubr.msk.bf16.mxu0 %vm2813_vm10, %v2812_v9 }
 0x25d   : > { %2665 = vmatpush3.bf16.xpose.msra.mxu1 %v3193_v32 }
 0x25e   : > { %2677 = vmatpush3.bf16.xpose.msra.mxu0 %v3284_v61  ;;  %2666 = vmatprep.subr.bf16.mxu1 %v2812_v9 }
 0x25f   : > { %2678 = vmatprep.subr.bf16.mxu0 %v2812_v9 }
 0x265   : > { %2667 = vmatpush3.bf16.xpose.msra.mxu1 %v3205_v36 }
 0x266   : > { %2679 = vmatpush3.bf16.xpose.msra.mxu0 %v3291_v62  ;;  %2668 = vmatprep.subr.bf16.mxu1 %v2812_v9 }
 0x267   : > { %2680 = vmatprep.subr.bf16.mxu0 %v2812_v9  ;;  %v1660_v27 = vpop.permute.xlu0 %1659 }
 0x269   : > { %v1952_v15 = vpop.permute.xlu1 %1951 }
 0x26d   : > { %2669 = vmatpush3.bf16.xpose.msra.mxu1 %v3215_v7 }
 0x26e   : > { %2681 = vmatpush3.bf16.xpose.msra.mxu0 %v3298_v46  ;;  %2686 = vmatprep.subr.bf16.mxu1 %v2812_v9 }
 0x26f   : > { %2698 = vmatprep.subr.bf16.mxu0 %v2812_v9 }
 0x274   : > { %2671 = vmatmul.mubr.msk.bf16.vlgmr.msra.gmra.mxu1 %vm1061_vm8, %v2386_v5 }
 0x275   : > { %2683 = vmatmul.mubr.msk.bf16.vlgmr.msra.gmra.mxu0 %vm1061_vm8, %v2388_v6  ;;  %2687 = vmatpush3.bf16.xpose.msra.mxu1 %v3176_v23 }
 0x276   : > { %2699 = vmatpush3.bf16.xpose.msra.mxu0 %v3173_v22  ;;  %2688 = vmatprep.subr.bf16.mxu1 %v2812_v9  ;;  %v2399_v22 = vld [vmem:[%s3454_s5 + $0x1a] sm:$0x3] }
 0x277   : > { %2700 = vmatprep.subr.bf16.mxu0 %v2812_v9  ;;  %2694 = vmatprep.mubr.msk.bf16.mxu1 %vm2813_vm10, %v2812_v9 }
 0x278   : > { %2706 = vmatprep.mubr.msk.bf16.mxu0 %vm2813_vm10, %v2812_v9 }
 0x27d   : > { %2689 = vmatpush3.bf16.xpose.msra.mxu1 %v3193_v32 }
 0x27e   : > { %2701 = vmatpush3.bf16.xpose.msra.mxu0 %v3190_v30  ;;  %2690 = vmatprep.subr.bf16.mxu1 %v2812_v9 }
 0x27f   : > { %2702 = vmatprep.subr.bf16.mxu0 %v2812_v9 }
 0x285   : > { %2691 = vmatpush3.bf16.xpose.msra.mxu1 %v3205_v36 }
 0x286   : > { %2703 = vmatpush3.bf16.xpose.msra.mxu0 %v3202_v35  ;;  %2692 = vmatprep.subr.bf16.mxu1 %v2812_v9 }
 0x287   : > { %2704 = vmatprep.subr.bf16.mxu0 %v2812_v9 }
 0x28d   : > { %2693 = vmatpush3.bf16.xpose.msra.mxu1 %v3215_v7 }
 0x28e   : > { %2705 = vmatpush3.bf16.xpose.msra.mxu0 %v3212_v39  ;;  %2710 = vmatprep.subr.bf16.mxu1 %v2812_v9 }
 0x28f   : > { %2722 = vmatprep.subr.bf16.mxu0 %v2812_v9 }
 0x294   : > { %2695 = vmatmul.mubr.msk.bf16.vlgmr.msra.gmra.mxu1 %vm1061_vm8, %v2391_v17 }
 0x295   : > { %2707 = vmatmul.mubr.msk.bf16.vlgmr.msra.gmra.mxu0 %vm1061_vm8, %v2390_v19  ;;  %2711 = vmatpush3.bf16.xpose.msra.mxu1 %v1835_v21 }
 0x296   : > { %2723 = vmatpush3.bf16.xpose.msra.mxu0 %v1905_v1  ;;  %2712 = vmatprep.subr.bf16.mxu1 %v2812_v9 }
 0x297   : > { %2724 = vmatprep.subr.bf16.mxu0 %v2812_v9  ;;  %2718 = vmatprep.mubr.msk.bf16.mxu1 %vm2813_vm10, %v2812_v9 }
 0x298   : > { %2730 = vmatprep.mubr.msk.bf16.mxu0 %vm2813_vm10, %v2812_v9 }
 0x29d   : > { %2713 = vmatpush3.bf16.xpose.msra.mxu1 %v3112_v57  ;;  %v2394_v57 = vld [vmem:[%s3454_s5 + $0x14] sm:$0x3] }
 0x29e   : > { %2725 = vmatpush3.bf16.xpose.msra.mxu0 %v3109_v56  ;;  %2714 = vmatprep.subr.bf16.mxu1 %v2812_v9 }
 0x29f   : > { %2726 = vmatprep.subr.bf16.mxu0 %v2812_v9 }
 0x2a5   : > { %2715 = vmatpush3.bf16.xpose.msra.mxu1 %v3134_v26  ;;  %v2396_v26 = vld [vmem:[%s3454_s5 + $0x16] sm:$0x3] }
 0x2a6   : > { %2727 = vmatpush3.bf16.xpose.msra.mxu0 %v3131_v31  ;;  %2716 = vmatprep.subr.bf16.mxu1 %v2812_v9 }
 0x2a7   : > { %2728 = vmatprep.subr.bf16.mxu0 %v2812_v9 }
 0x2ad   : > { %2717 = vmatpush3.bf16.xpose.msra.mxu1 %v3144_v4  ;;  %v2171_v4 = vld [vmem:[#allocation2 + $0x92] sm:$0xff] }
 0x2ae   : > { %2729 = vmatpush3.bf16.xpose.msra.mxu0 %v3141_v3  ;;  %2734 = vmatprep.subr.bf16.mxu1 %v2812_v9  ;;  %v2175_v16 = vpack.c.bf16 %v2171_v4, %v3259_v25 }
 0x2af   : > { %2746 = vmatprep.subr.bf16.mxu0 %v2812_v9 }
 0x2b0   : > { %v2191_v30 = vsel %vm1061_vm8, %v2175_v16, 0 }
 0x2b4   : > { %2719 = vmatmul.mubr.msk.bf16.vlgmr.msra.gmra.mxu1 %vm1061_vm8, %v2394_v57 }
 0x2b5   : > { %2731 = vmatmul.mubr.msk.bf16.vlgmr.msra.gmra.mxu0 %vm1061_vm8, %v2396_v26  ;;  %2735 = vmatpush3.bf16.xpose.msra.mxu1 %v3273_v38 }
 0x2b6   : > { %2747 = vmatpush3.bf16.xpose.msra.mxu0 %v3176_v23  ;;  %2736 = vmatprep.subr.bf16.mxu1 %v2812_v9  ;;  %v2398_v23 = vld [vmem:[%s3454_s5 + $0x18] sm:$0x3] }
 0x2b7   : > { %2748 = vmatprep.subr.bf16.mxu0 %v2812_v9  ;;  %2742 = vmatprep.mubr.msk.bf16.mxu1 %vm2813_vm10, %v2812_v9 }
 0x2b8   : > { %2754 = vmatprep.mubr.msk.bf16.mxu0 %vm2813_vm10, %v2812_v9 }
 0x2bd   : > { %2737 = vmatpush3.bf16.xpose.msra.mxu1 %v3284_v61 }
 0x2be   : > { %2749 = vmatpush3.bf16.xpose.msra.mxu0 %v3193_v32  ;;  %2738 = vmatprep.subr.bf16.mxu1 %v2812_v9 }
 0x2bf   : > { %2750 = vmatprep.subr.bf16.mxu0 %v2812_v9 }
 0x2c5   : > { %2739 = vmatpush3.bf16.xpose.msra.mxu1 %v3291_v62 }
 0x2c6   : > { %2751 = vmatpush3.bf16.xpose.msra.mxu0 %v3205_v36  ;;  %2740 = vmatprep.subr.bf16.mxu1 %v2812_v9 }
 0x2c7   : > { %2752 = vmatprep.subr.bf16.mxu0 %v2812_v9 }
 0x2cd   : > { %2741 = vmatpush3.bf16.xpose.msra.mxu1 %v3298_v46 }
 0x2ce   : > { %2753 = vmatpush3.bf16.xpose.msra.mxu0 %v3215_v7  ;;  %2758 = vmatprep.subr.bf16.mxu1 %v2812_v9 }
 0x2cf   : > { %2770 = vmatprep.subr.bf16.mxu0 %v2812_v9 }
 0x2d4   : > { %v1168_v24 = vpop.f32.mrf.mxu1  ;;  %2743 = vmatmul.mubr.msk.bf16.vlgmr.msra.gmra.mxu1 %vm1061_vm8, %v2399_v22 }
 0x2d5   : > { %v1223_v28 = vpop.f32.mrf.mxu0  ;;  %2755 = vmatmul.mubr.msk.bf16.vlgmr.msra.gmra.mxu0 %vm1061_vm8, %v2398_v23  ;;  %2759 = vmatpush3.bf16.xpose.msra.mxu1 %v1905_v1 }
 0x2d6   : > { %2771 = vmatpush3.bf16.xpose.msra.mxu0 %v2191_v30  ;;  %v2600_v32 = vpop.f32.mrf.mxu1  ;;  %2760 = vmatprep.subr.bf16.mxu1 %v2812_v9  ;;  %v1224_v39 = vadd.f32 %v1223_v28, %v1168_v24 }
 0x2d7   : > { %v2612_v33 = vpop.f32.mrf.mxu0  ;;  %2772 = vmatprep.subr.bf16.mxu0 %v2812_v9  ;;  %2766 = vmatprep.mubr.msk.bf16.mxu1 %vm2813_vm10, %v2812_v9 }
 0x2d8   : > { %2778 = vmatprep.mubr.msk.bf16.mxu0 %vm2813_vm10, %v2812_v9  ;;  %v1171_v34 = vpop.f32.mrf.mxu1 }
 0x2d9   : > { %v1226_v35 = vpop.f32.mrf.mxu0 }
 0x2da   : > { %v2601_v36 = vpop.f32.mrf.mxu1 }
 0x2db   : > { %v2613_v37 = vpop.f32.mrf.mxu0 }
 0x2dd   : > { %2761 = vmatpush3.bf16.xpose.msra.mxu1 %v3109_v56  ;;  %v2402_v56 = vld [vmem:[%s3454_s5 + $0x1c] sm:$0x3] }
 0x2de   : > { %2773 = vmatpush3.bf16.xpose.msra.mxu0 %v3230_v44  ;;  %2762 = vmatprep.subr.bf16.mxu1 %v2812_v9 }
 0x2df   : > { %2774 = vmatprep.subr.bf16.mxu0 %v2812_v9 }
 0x2e5   : > { %2763 = vmatpush3.bf16.xpose.msra.mxu1 %v3131_v31 }
 0x2e6   : > { %2775 = vmatpush3.bf16.xpose.msra.mxu0 %v3244_v50  ;;  %2764 = vmatprep.subr.bf16.mxu1 %v2812_v9 }
 0x2e7   : > { %2776 = vmatprep.subr.bf16.mxu0 %v2812_v9 }
 0x2ed   : > { %2765 = vmatpush3.bf16.xpose.msra.mxu1 %v3141_v3 }
 0x2ee   : > { %2777 = vmatpush3.bf16.xpose.msra.mxu0 %v3251_v55 }
 0x2f4   : > { %v1292_v31 = vpop.f32.mrf.mxu1  ;;  %2767 = vmatmul.mubr.msk.bf16.vlgmr.msra.gmra.mxu1 %vm1061_vm8, %v2402_v56 }
 0x2f5   : > { %v1362_v7 = vpop.f32.mrf.mxu0  ;;  %2779 = vmatmul.mubr.msk.bf16.vlgmr.msra.gmra.mxu0 %vm1061_vm8, %v2404_v52  ;;  %v1298_v9 = vadd.f32 %v1292_v31, %v1224_v39  ;;  %v2238_v52 = vpop.permute.xlu0 %2237 }
 0x2f6   : > { %v2624_v3 = vpop.f32.mrf.mxu1 }
 0x2f7   : > { %v2636_v40 = vpop.f32.mrf.mxu0  ;;  %v1368_v41 = vadd.f32 %v1362_v7, %v1298_v9 }
 0x2f8   : > { %v1295_v42 = vpop.f32.mrf.mxu1 }
 0x2f9   : > { %v1365_v43 = vpop.f32.mrf.mxu0  ;;  %v1375_v44 = vadd.f32 %v1373_v13, %v1368_v41 }
 0x2fa   : > { %v2625_v45 = vpop.f32.mrf.mxu1 }
 0x2fb   : > { %v2637_v47 = vpop.f32.mrf.mxu0  ;;  %1377 = vst.msk [vmem:[%s3434_s22] sm:$0xf] %vm1376_vm3, %v1375_v44 }
 0x314   : > { %v1455_v48 = vpop.f32.mrf.mxu1 }
 0x315   : > { %v1510_v49 = vpop.f32.mrf.mxu0 }
 0x316   : > { %v2648_v50 = vpop.f32.mrf.mxu1  ;;  %v1511_v2 = vadd.f32 %v1510_v49, %v1455_v48 }
 0x317   : > { %v2660_v51 = vpop.f32.mrf.mxu0 }
 0x318   : > { %v1458_v53 = vpop.f32.mrf.mxu1 }
 0x319   : > { %v1513_v54 = vpop.f32.mrf.mxu0 }
 0x31a   : > { %v2649_v55 = vpop.f32.mrf.mxu1 }
 0x31b   : > { %v2661_v58 = vpop.f32.mrf.mxu0 }
 0x334   : > { %v1579_v59 = vpop.f32.mrf.mxu1 }
 0x335   : > { %v1649_v20 = vpop.f32.mrf.mxu0  ;;  %v1585_v25 = vadd.f32 %v1579_v59, %v1511_v2 }
 0x336   : > { %v2672_v29 = vpop.f32.mrf.mxu1 }
 0x337   : > { %v2684_v18 = vpop.f32.mrf.mxu0  ;;  %v1655_v38 = vadd.f32 %v1649_v20, %v1585_v25 }
 0x338   : > { %v1582_v60 = vpop.f32.mrf.mxu1 }
 0x339   : > { %v1652_v61 = vpop.f32.mrf.mxu0  ;;  %v1662_v0 = vadd.f32 %v1660_v27, %v1655_v38 }
 0x33a   : > { %v2673_v62 = vpop.f32.mrf.mxu1 }
 0x33b   : > { %v2685_v63 = vpop.f32.mrf.mxu0  ;;  %1664 = vrot.lane.b32.xlu0 %v1662_v0, %s2815_s25 }
 0x354   : > { %v1746_v46 = vpop.f32.mrf.mxu1 }
 0x355   : > { %v1801_v5 = vpop.f32.mrf.mxu0 }
 0x356   : > { %v2696_v6 = vpop.f32.mrf.mxu1  ;;  %v1802_v17 = vadd.f32 %v1801_v5, %v1746_v46 }
 0x357   : > { %v2708_v8 = vpop.f32.mrf.mxu0 }
 0x358   : > { %v1749_v10 = vpop.f32.mrf.mxu1 }
 0x359   : > { %v1804_v11 = vpop.f32.mrf.mxu0 }
 0x35a   : > { %v2697_v12 = vpop.f32.mrf.mxu1 }
 0x35b   : > { %v2709_v14 = vpop.f32.mrf.mxu0 }
 0x374   : > { %v1871_v19 = vpop.f32.mrf.mxu1 }
 0x375   : > { %v1941_v21 = vpop.f32.mrf.mxu0  ;;  %v1877_v1 = vadd.f32 %v1871_v19, %v1802_v17 }
 0x376   : > { %v2720_v57 = vpop.f32.mrf.mxu1 }
 0x377   : > { %v2732_v26 = vpop.f32.mrf.mxu0  ;;  %v1947_v4 = vadd.f32 %v1941_v21, %v1877_v1 }
 0x378   : > { %v1874_v16 = vpop.f32.mrf.mxu1 }
 0x379   : > { %v1944_v22 = vpop.f32.mrf.mxu0  ;;  %v1954_v23 = vadd.f32 %v1952_v15, %v1947_v4 }
 0x37a   : > { %v2721_v24 = vpop.f32.mrf.mxu1 }
 0x37b   : > { %v2733_v28 = vpop.f32.mrf.mxu0  ;;  %1955 = vst.msk [vmem:[%s3434_s22 + $0x4] sm:$0xf] %vm1376_vm3, %v1954_v23 }
 0x394   : > { %v2033_v30 = vpop.f32.mrf.mxu1 }
 0x395   : > { %v2088_v32 = vpop.f32.mrf.mxu0 }
 0x396   : > { %v2744_v33 = vpop.f32.mrf.mxu1  ;;  %v2089_v31 = vadd.f32 %v2088_v32, %v2033_v30 }
 0x397   : > { %v2756_v34 = vpop.f32.mrf.mxu0 }
 0x398   : > { %v2036_v35 = vpop.f32.mrf.mxu1 }
 0x399   : > { %v2091_v36 = vpop.f32.mrf.mxu0 }
 0x39a   : > { %v2745_v37 = vpop.f32.mrf.mxu1 }
 0x39b   : > { %v2757_v56 = vpop.f32.mrf.mxu0 }
 0x3ad   : > { %v1665_v39 = vpop.permute.xlu0 %1664 }
 0x3ae   : > { %1668 = vst.msk [vmem:[%s3434_s22] sm:$0xf] %vm1667_vm4, %v1665_v39 }
 0x3b4   : > { %v2157_v7 = vpop.f32.mrf.mxu1 }
 0x3b5   : > { %v2227_v9 = vpop.f32.mrf.mxu0  ;;  %v2163_v13 = vadd.f32 %v2157_v7, %v2089_v31 }
 0x3b6   : > { %v2768_v3 = vpop.f32.mrf.mxu1 }
 0x3b7   : > { %v2780_v40 = vpop.f32.mrf.mxu0  ;;  %v2233_v41 = vadd.f32 %v2227_v9, %v2163_v13 }
 0x3b8   : > { %v2160_v42 = vpop.f32.mrf.mxu1 }
 0x3b9   : > { %v2230_v43 = vpop.f32.mrf.mxu0  ;;  %v2240_v44 = vadd.f32 %v2238_v52, %v2233_v41 }
 0x3ba   : > { %v2769_v45 = vpop.f32.mrf.mxu1 }
 0x3bb   : > { %v2781_v47 = vpop.f32.mrf.mxu0  ;;  %2242 = vrot.lane.b32.xlu1 %v2240_v44, %s2815_s25 }
 0x42d   : > { %v2243_v48 = vpop.permute.xlu1 %2242 }
 0x42e   : > { %2245 = vst.msk [vmem:[%s3434_s22 + $0x4] sm:$0xf] %vm1667_vm4, %v2243_v48 }
 0x42f PF: > { %s17_s24 = sadd.s32 1, %s2810_s24  }
 0x430   : > { %p14_p4 = scmp.ge.s32.totalorder %s17_s24, 4  }
 0x432   :  { %16 = sbr.rel (!%p14_p4) target bundleno = 1 (0x1), region = 98 }

</bundles_post_ra>
